<compile_context>
chip_gen: v7x
topology: tpu7x:2x2x1
jax: 0.10.0
libtpu: 0.0.40
codegen_flags: <defaults>
</compile_context>

<pallas_src>
import math

import jax
import jax.numpy as jnp
from jax.experimental import pallas as pl
from jax.experimental.pallas import tpu as pltpu


LANE = 128
SQRT_2_OVER_PI = 0.7978845608028654


def _round_up(n, m):
    return (n + m - 1) // m * m


# ------------------------------ Pallas kernel ------------------------------

def ffn_kernel(x_ref, w1_ref, t1_ref, w2_ref, t2_ref,
               wp_ref, bp_ref, gp_ref, o_ref):
    # x arrives in its native dtype (typically f32); the bf16 cast for the MXU
    # happens here, in VMEM, so the residual add below stays full precision
    # and the wrapper never does an extra pad+cast HBM round trip.
    x = x_ref[...]
    xb = x.astype(jnp.bfloat16)

    # fc1: 1x1 conv (BN1 scale pre-folded into columns) + shift, then ReLU
    h = jnp.dot(xb, w1_ref[...], preferred_element_type=jnp.float32)   # (TM, Hp)
    h = jnp.maximum(h + t1_ref[...], 0.0)

    # fc2: 1x1 conv (BN2 scale and the 0.8 blend coefficient pre-folded)
    y = jnp.dot(h.astype(jnp.bfloat16), w2_ref[...],
                preferred_element_type=jnp.float32)                    # (TM, Cp)
    y = y + t2_ref[...]                       # y == 0.8 * BN2(fc2(relu(...)))

    # LoRPrompterDown: 1x1 down-projection (wp pre-divided by 0.8 so it sees
    # the un-blended fc2 output) + tanh-approx GELU (EUP slot, not VALU)
    lr = jnp.dot(y.astype(jnp.bfloat16), wp_ref[...],
                 preferred_element_type=jnp.float32) + bp_ref[...]     # (TM, Rp)
    lr = 0.5 * lr * (1.0 + jnp.tanh(SQRT_2_OVER_PI *
                                    (lr + 0.044715 * (lr * lr * lr))))

    # low_rank @ graph_prompt (0.2 blend coefficient folded into gp)
    res = jnp.dot(lr.astype(jnp.bfloat16), gp_ref[...],
                  preferred_element_type=jnp.float32)                  # (TM, Cp)

    # blend + residual shortcut (DropPath(0.0) == identity); x is un-rounded.
    o_ref[...] = (y + res + x.astype(jnp.float32)).astype(o_ref.dtype)


# ------------------------------ parameter prep -----------------------------

def prepare_ffn_params(params):
    """Fold constants, pad to 128-lane multiples, cast matmul weights to bf16.

    Folds: BN1/BN2 scales into the conv columns, the 0.8 blend into w2/t2
    (compensated by wp /= 0.8), and the 0.2 blend into graph_prompt.
    Done once at parameter-preparation time, not per call.
    """
    w1 = params["w1"] * params["s1"]               # fold BN1 scale into fc1 cols
    t1 = params["t1"]
    w2 = params["w2"] * params["s2"] * 0.8         # fold BN2 scale + 0.8 blend
    t2 = params["t2"] * 0.8
    wp = params["wp"] / 0.8                        # undo blend fold for prompter
    bp = params["bp"]
    gp = params["gp"] * 0.2                        # fold 0.2 blend into gp

    C, Hid = w1.shape
    R = wp.shape[1]
    Cp, Hp, Rp = _round_up(C, LANE), _round_up(Hid, LANE), _round_up(R, LANE)

    pad2 = lambda a, r, c: jnp.pad(a, ((0, r - a.shape[0]), (0, c - a.shape[1])))

    return {
        "C": C, "Cp": Cp, "Hp": Hp, "Rp": Rp,
        "w1": pad2(w1, Cp, Hp).astype(jnp.bfloat16),
        "t1": pad2(t1, 1, Hp).astype(jnp.float32),
        "w2": pad2(w2, Hp, Cp).astype(jnp.bfloat16),
        "t2": pad2(t2, 1, Cp).astype(jnp.float32),
        "wp": pad2(wp, Cp, Rp).astype(jnp.bfloat16),
        "bp": pad2(bp, 1, Rp).astype(jnp.float32),
        "gp": pad2(gp, Rp, Cp).astype(jnp.bfloat16),
    }


# ------------------------------ tiling policy ------------------------------

def _vmem_capacity_bytes():
    """Physical VMEM of the attached TPU (64 MiB fallback == v7x, smallest)."""
    try:
        info = pltpu.get_tpu_info()
        cap = int(getattr(info, "vmem_capacity_bytes", 0) or 0)
        if cap > 0:
            return cap
    except Exception:
        pass
    return 64 * 1024 * 1024


def _vmem_need_bytes(tm, Cp, Hp, Rp, in_bytes, out_bytes):
    weights = 2 * (Cp * Hp + Hp * Cp + Cp * Rp + Rp * Cp)   # bf16, single-buffered
    shifts = 4 * 8 * (Hp + Cp + Rp)                         # f32, 8-sublane padded
    act = 2 * tm * Cp * in_bytes                            # x tile, double-buffered
    out = 2 * tm * Cp * out_bytes                           # out tile, double-buffered
    inter = tm * (Hp + 2 * Cp + Rp) * 6                     # f32 h/y/lr/res + bf16 copies
    return weights + shifts + act + out + inter


def _choose_tiling(N, Cp, Hp, Rp, in_bytes, out_bytes, tile_m=None):
    """Generation-aware tile_m / VMEM cap (budgeted against physical VMEM)."""
    cap = _vmem_capacity_bytes()
    if tile_m is None:
        tile_m = 128
        for cand in (1024, 768, 512, 384, 256, 128):
            if _vmem_need_bytes(cand, Cp, Hp, Rp, in_bytes, out_bytes) <= int(cap * 0.7):
                tile_m = cand
                break
        # TODO(synk): for hidden dims so large that even tm=128 blows the VMEM
        # budget, add an inner loop over hidden blocks:
        #   y += relu(x @ w1[:, hb] + t1[hb]) @ w2[hb, :]   (exact, per-unit ReLU)
        # v7x has 2 TensorCores: prefer >= 2 grid steps on the parallel row axis.
        if N > LANE:
            tile_m = min(tile_m, max(LANE, _round_up(pl.cdiv(N, 2), LANE)))
    need = _vmem_need_bytes(tile_m, Cp, Hp, Rp, in_bytes, out_bytes)
    vmem_limit = int(max(32 * 1024 * 1024,
                         min(cap - 8 * 1024 * 1024, 2 * need)))
    return tile_m, vmem_limit


# ------------------------------ wrappers ------------------------------------

def ffn_pallas_rows(x_rows, prep, *, out_dtype=jnp.bfloat16, tile_m=None):
    """Core entry point on (N, C) channels-last pixel rows.

    x is consumed in its native dtype (cast to bf16 in-VMEM for the MXU); the
    output defaults to bf16 to halve writeback DMA -- pass out_dtype=f32 for a
    full-precision result.  Padding / slicing happens only when shapes are not
    already tile/lane aligned.
    """
    N, C = x_rows.shape
    assert C == prep["C"]
    Cp, Hp, Rp = prep["Cp"], prep["Hp"], prep["Rp"]

    in_bytes = jnp.dtype(x_rows.dtype).itemsize
    out_bytes = jnp.dtype(out_dtype).itemsize
    tile_m, vmem_limit = _choose_tiling(N, Cp, Hp, Rp, in_bytes, out_bytes, tile_m)

    Np = _round_up(N, tile_m)
    needs_pad = (Np != N) or (Cp != C)
    xb = jnp.pad(x_rows, ((0, Np - N), (0, Cp - C))) if needs_pad else x_rows

    # Constant-index blocks (weights / shifts): single-buffered to save VMEM.
    def const(shape):
        nd = len(shape)
        return pl.BlockSpec(shape, lambda i: (0,) * nd,
                            pipeline_mode=pl.Buffered(1))

    weight_bytes = 2 * (Cp * Hp + Hp * Cp + Cp * Rp + Rp * Cp) + 4 * (Hp + Cp + Rp)
    cost = pl.CostEstimate(
        flops=2 * Np * (Cp * Hp + Hp * Cp + Cp * Rp + Rp * Cp),
        transcendentals=Np * Rp,
        bytes_accessed=Np * Cp * (in_bytes + out_bytes) + weight_bytes,
    )

    out = pl.pallas_call(
        ffn_kernel,
        out_shape=jax.ShapeDtypeStruct((Np, Cp), out_dtype),
        grid_spec=pltpu.PrefetchScalarGridSpec(
            num_scalar_prefetch=0,
            grid=(Np // tile_m,),
            in_specs=[
                pl.BlockSpec((tile_m, Cp), lambda i: (i, 0)),   # x tile (native dtype)
                const((Cp, Hp)),                                # w1 (BN1 scale folded)
                const((1, Hp)),                                 # bn1 shift (+bias)
                const((Hp, Cp)),                                # w2 (BN2 scale * 0.8)
                const((1, Cp)),                                 # bn2 shift * 0.8 (+bias)
                const((Cp, Rp)),                                # prompter weight / 0.8
                const((1, Rp)),                                 # prompter bias
                const((Rp, Cp)),                                # graph_prompt * 0.2
            ],
            out_specs=pl.BlockSpec((tile_m, Cp), lambda i: (i, 0)),
        ),
        compiler_params=pltpu.CompilerParams(
            dimension_semantics=("parallel",),
            vmem_limit_bytes=vmem_limit,
        ),
        cost_estimate=cost,
    )(xb, prep["w1"], prep["t1"], prep["w2"], prep["t2"],
      prep["wp"], prep["bp"], prep["gp"])

    return out[:N, :C] if needs_pad else out


def ffn_pallas_nhwc(x_nhwc, prep, *, out_dtype=None, tile_m=None):
    """Channels-last path: no layout transposes at all (preferred)."""
    if out_dtype is None:
        out_dtype = x_nhwc.dtype
    B, H, W, C = x_nhwc.shape
    y = ffn_pallas_rows(x_nhwc.reshape(B * H * W, C), prep,
                        out_dtype=out_dtype, tile_m=tile_m)
    return y.reshape(B, H, W, C)


def ffn_pallas_nchw(x_nchw, prep, *, out_dtype=None, tile_m=None):
    """PyTorch-layout wrapper.  The NCHW<->NHWC transposes live here, outside
    the kernel; callers that can keep NHWC should use ffn_pallas_nhwc."""
    if out_dtype is None:
        out_dtype = x_nchw.dtype
    B, C, H, W = x_nchw.shape
    x = jnp.transpose(x_nchw, (0, 2, 3, 1)).reshape(B * H * W, C)
    y = ffn_pallas_rows(x, prep, out_dtype=out_dtype, tile_m=tile_m)
    return y.reshape(B, H, W, C).transpose(0, 3, 1, 2)


# ------------------------------ reference -----------------------------------

def ffn_ref(x_nchw, p):
    """Pure-JAX f32 reference matching the PyTorch module (exact-erf GELU)."""
    B, C, H, W = x_nchw.shape
    x = jnp.transpose(x_nchw, (0, 2, 3, 1)).reshape(B * H * W, C)
    h = x @ p["w1"] * p["s1"] + p["t1"]
    h = jnp.maximum(h, 0.0)
    y = h @ p["w2"] * p["s2"] + p["t2"]
    lr = y @ p["wp"] + p["bp"]
    lr = 0.5 * lr * (1.0 + jax.lax.erf(lr / math.sqrt(2.0)))
    res = lr @ p["gp"]
    out = y * 0.8 + res * 0.2 + x
    return out.reshape(B, H, W, C).transpose(0, 3, 1, 2)


# ------------------------------ params --------------------------------------

def make_params(key, in_features, hidden_features, rank_dim, eps=1e-5):
    ks = jax.random.split(key, 12)
    f32 = jnp.float32

    # fc1 conv (hidden, in, 1, 1) -> matmul weight (in, hidden), plus bias
    w1 = jax.random.normal(ks[0], (in_features, hidden_features), f32) * 0.1
    b1 = jax.random.normal(ks[1], (hidden_features,), f32) * 0.1
    g1 = 1.0 + 0.1 * jax.random.normal(ks[2], (hidden_features,), f32)
    be1 = 0.1 * jax.random.normal(ks[3], (hidden_features,), f32)
    m1 = 0.1 * jax.random.normal(ks[4], (hidden_features,), f32)
    v1 = jnp.abs(jax.random.normal(ks[5], (hidden_features,), f32)) + 0.5

    # fc2 conv (out, hidden, 1, 1) -> (hidden, out), out == in_features
    w2 = jax.random.normal(ks[6], (hidden_features, in_features), f32) * 0.1
    b2 = jax.random.normal(ks[7], (in_features,), f32) * 0.1
    g2 = 1.0 + 0.1 * jax.random.normal(ks[8], (in_features,), f32)
    be2 = 0.1 * jax.random.normal(ks[9], (in_features,), f32)
    m2 = 0.1 * jax.random.normal(ks[10], (in_features,), f32)
    v2 = jnp.abs(jax.random.normal(ks[11], (in_features,), f32)) + 0.5

    # fold conv bias + BN (eval mode) into per-channel scale/shift
    s1 = g1 / jnp.sqrt(v1 + eps)
    t1 = (b1 - m1) * s1 + be1
    s2 = g2 / jnp.sqrt(v2 + eps)
    t2 = (b2 - m2) * s2 + be2

    kp1, kp2, kg = jax.random.split(ks[0], 3)
    wp = jax.random.normal(kp1, (in_features, rank_dim), f32) * 0.1
    bp = jax.random.normal(kp2, (rank_dim,), f32) * 0.1
    # graph_prompt is initialized to zeros in the module; use small random
    # values here so the low-rank path is actually exercised.
    gp = jax.random.normal(kg, (rank_dim, in_features), f32) * 0.1

    return {
        "w1": w1, "s1": s1.reshape(1, -1), "t1": t1.reshape(1, -1),
        "w2": w2, "s2": s2.reshape(1, -1), "t2": t2.reshape(1, -1),
        "wp": wp, "bp": bp.reshape(1, -1), "gp": gp,
    }


# ------------------------------ main -----------------------------------------

if __name__ == "__main__":
    # batch, in_features(=out_features), spatial (W chosen so B*H*W is NOT a
    # multiple of the row tile -> exercises the row-padding path)
    B, C, H, W = 2, 16, 16, 12
    HIDDEN, RANK = 32, 8

    key = jax.random.PRNGKey(0)
    kx, kp = jax.random.split(key)
    x = jax.random.normal(kx, (B, C, H, W), jnp.float32)
    params = make_params(kp, C, HIDDEN, RANK)
    prep = prepare_ffn_params(params)

    out = ffn_pallas_nchw(x, prep)            # f32 output (matches input dtype)
    out = jax.block_until_ready(out)

    ref = ffn_ref(x, params)
    assert out.shape == (B, C, H, W)
    # bf16 MXU operands + tanh-approx GELU vs the exact f32/erf reference; the
    # residual shortcut is now full-precision f32, so the tolerance tightens.
    assert jnp.allclose(out, ref, atol=3e-2, rtol=3e-2), (
        float(jnp.max(jnp.abs(out - ref))))

    print("KERNEL_OK")
</pallas_src>

<mosaic_0001>
module attributes {stable_mosaic.version = 11 : i64} {
  func.func @ffn_kernel(%arg0: i32, %arg1: memref<256x128xf32, #tpu.memory_space<vmem>>, %arg2: memref<128x128xbf16, #tpu.memory_space<vmem>>, %arg3: memref<1x128xf32, #tpu.memory_space<vmem>>, %arg4: memref<128x128xbf16, #tpu.memory_space<vmem>>, %arg5: memref<1x128xf32, #tpu.memory_space<vmem>>, %arg6: memref<128x128xbf16, #tpu.memory_space<vmem>>, %arg7: memref<1x128xf32, #tpu.memory_space<vmem>>, %arg8: memref<128x128xbf16, #tpu.memory_space<vmem>>, %arg9: memref<256x128xf32, #tpu.memory_space<vmem>>) attributes {dimension_semantics = [#tpu.dimension_semantics<parallel>], iteration_bounds = array<i64: 2>, scalar_prefetch = 0 : i64, scratch_operands = 0 : i64, tpu.core_type = #tpu.core_type<tc>, window_params = [{transform_indices = @transform_0, window_bounds = array<i64: 256, 128>}, {pipeline_mode = #tpu.pipeline_mode<synchronous>, transform_indices = @transform_1, window_bounds = array<i64: 128, 128>}, {pipeline_mode = #tpu.pipeline_mode<synchronous>, transform_indices = @transform_2, window_bounds = array<i64: 1, 128>}, {pipeline_mode = #tpu.pipeline_mode<synchronous>, transform_indices = @transform_3, window_bounds = array<i64: 128, 128>}, {pipeline_mode = #tpu.pipeline_mode<synchronous>, transform_indices = @transform_4, window_bounds = array<i64: 1, 128>}, {pipeline_mode = #tpu.pipeline_mode<synchronous>, transform_indices = @transform_5, window_bounds = array<i64: 128, 128>}, {pipeline_mode = #tpu.pipeline_mode<synchronous>, transform_indices = @transform_6, window_bounds = array<i64: 1, 128>}, {pipeline_mode = #tpu.pipeline_mode<synchronous>, transform_indices = @transform_7, window_bounds = array<i64: 128, 128>}, {transform_indices = @transform_8, window_bounds = array<i64: 256, 128>}]} {
    %c0 = arith.constant 0 : index
    %c0_0 = arith.constant 0 : index
    %0 = vector.load %arg1[%c0, %c0_0] : memref<256x128xf32, #tpu.memory_space<vmem>>, vector<256x128xf32>
    %1 = arith.truncf %0 : vector<256x128xf32> to vector<256x128xbf16>
    %c0_1 = arith.constant 0 : index
    %c0_2 = arith.constant 0 : index
    %2 = vector.load %arg2[%c0_1, %c0_2] : memref<128x128xbf16, #tpu.memory_space<vmem>>, vector<128x128xbf16>
    %cst = arith.constant dense<0.000000e+00> : vector<256x128xf32>
    %3 = tpu.matmul %1, %2, %cst {dimension_numbers = #tpu.dot_dimension_numbers<[1], [0], [0], [1], [0, 0, 1, 1], [], []>} : vector<256x128xbf16>, vector<128x128xbf16>, vector<256x128xf32> -> vector<256x128xf32>
    %c0_3 = arith.constant 0 : index
    %c0_4 = arith.constant 0 : index
    %4 = vector.load %arg3[%c0_3, %c0_4] : memref<1x128xf32, #tpu.memory_space<vmem>>, vector<1x128xf32>
    %5 = vector.broadcast %4 : vector<1x128xf32> to vector<256x128xf32>
    %6 = arith.addf %3, %5 : vector<256x128xf32>
    %cst_5 = arith.constant 0.000000e+00 : f32
    %7 = vector.broadcast %cst_5 : f32 to vector<256x128xf32>
    %8 = arith.maximumf %6, %7 : vector<256x128xf32>
    %9 = arith.truncf %8 : vector<256x128xf32> to vector<256x128xbf16>
    %c0_6 = arith.constant 0 : index
    %c0_7 = arith.constant 0 : index
    %10 = vector.load %arg4[%c0_6, %c0_7] : memref<128x128xbf16, #tpu.memory_space<vmem>>, vector<128x128xbf16>
    %cst_8 = arith.constant dense<0.000000e+00> : vector<256x128xf32>
    %11 = tpu.matmul %9, %10, %cst_8 {dimension_numbers = #tpu.dot_dimension_numbers<[1], [0], [0], [1], [0, 0, 1, 1], [], []>} : vector<256x128xbf16>, vector<128x128xbf16>, vector<256x128xf32> -> vector<256x128xf32>
    %c0_9 = arith.constant 0 : index
    %c0_10 = arith.constant 0 : index
    %12 = vector.load %arg5[%c0_9, %c0_10] : memref<1x128xf32, #tpu.memory_space<vmem>>, vector<1x128xf32>
    %13 = vector.broadcast %12 : vector<1x128xf32> to vector<256x128xf32>
    %14 = arith.addf %11, %13 : vector<256x128xf32>
    %15 = arith.truncf %14 : vector<256x128xf32> to vector<256x128xbf16>
    %c0_11 = arith.constant 0 : index
    %c0_12 = arith.constant 0 : index
    %16 = vector.load %arg6[%c0_11, %c0_12] : memref<128x128xbf16, #tpu.memory_space<vmem>>, vector<128x128xbf16>
    %cst_13 = arith.constant dense<0.000000e+00> : vector<256x128xf32>
    %17 = tpu.matmul %15, %16, %cst_13 {dimension_numbers = #tpu.dot_dimension_numbers<[1], [0], [0], [1], [0, 0, 1, 1], [], []>} : vector<256x128xbf16>, vector<128x128xbf16>, vector<256x128xf32> -> vector<256x128xf32>
    %c0_14 = arith.constant 0 : index
    %c0_15 = arith.constant 0 : index
    %18 = vector.load %arg7[%c0_14, %c0_15] : memref<1x128xf32, #tpu.memory_space<vmem>>, vector<1x128xf32>
    %19 = vector.broadcast %18 : vector<1x128xf32> to vector<256x128xf32>
    %20 = arith.addf %17, %19 : vector<256x128xf32>
    %cst_16 = arith.constant 5.000000e-01 : f32
    %21 = vector.broadcast %cst_16 : f32 to vector<256x128xf32>
    %22 = arith.mulf %21, %20 : vector<256x128xf32>
    %23 = arith.mulf %20, %20 : vector<256x128xf32>
    %24 = arith.mulf %23, %20 : vector<256x128xf32>
    %cst_17 = arith.constant 4.471500e-02 : f32
    %25 = vector.broadcast %cst_17 : f32 to vector<256x128xf32>
    %26 = arith.mulf %25, %24 : vector<256x128xf32>
    %27 = arith.addf %20, %26 : vector<256x128xf32>
    %cst_18 = arith.constant 0.797884583 : f32
    %28 = vector.broadcast %cst_18 : f32 to vector<256x128xf32>
    %29 = arith.mulf %28, %27 : vector<256x128xf32>
    %30 = math.tanh %29 : vector<256x128xf32>
    %cst_19 = arith.constant 1.000000e+00 : f32
    %31 = vector.broadcast %cst_19 : f32 to vector<256x128xf32>
    %32 = arith.addf %31, %30 : vector<256x128xf32>
    %33 = arith.mulf %22, %32 : vector<256x128xf32>
    %34 = arith.truncf %33 : vector<256x128xf32> to vector<256x128xbf16>
    %c0_20 = arith.constant 0 : index
    %c0_21 = arith.constant 0 : index
    %35 = vector.load %arg8[%c0_20, %c0_21] : memref<128x128xbf16, #tpu.memory_space<vmem>>, vector<128x128xbf16>
    %cst_22 = arith.constant dense<0.000000e+00> : vector<256x128xf32>
    %36 = tpu.matmul %34, %35, %cst_22 {dimension_numbers = #tpu.dot_dimension_numbers<[1], [0], [0], [1], [0, 0, 1, 1], [], []>} : vector<256x128xbf16>, vector<128x128xbf16>, vector<256x128xf32> -> vector<256x128xf32>
    %37 = arith.addf %14, %36 : vector<256x128xf32>
    %38 = arith.addf %37, %0 : vector<256x128xf32>
    %c0_23 = arith.constant 0 : index
    %c0_24 = arith.constant 0 : index
    %39 = vector.load %arg9[%c0_23, %c0_24] : memref<256x128xf32, #tpu.memory_space<vmem>>, vector<256x128xf32>
    tpu.vector_store %arg9[%c0_23, %c0_24], %38 {strides = array<i32>} : memref<256x128xf32, #tpu.memory_space<vmem>>, vector<256x128xf32>,
    return
  }
  func.func @transform_0(%arg0: i32) -> (i32, i32) {
    %c0_i32 = arith.constant 0 : i32
    %c0_i32_0 = arith.constant 0 : i32
    return %arg0, %c0_i32 : i32, i32
  }
  func.func @transform_1(%arg0: i32) -> (i32, i32) {
    %c0_i32 = arith.constant 0 : i32
    %c0_i32_0 = arith.constant 0 : i32
    %c0_i32_1 = arith.constant 0 : i32
    return %c0_i32, %c0_i32_0 : i32, i32
  }
  func.func @transform_2(%arg0: i32) -> (i32, i32) {
    %c0_i32 = arith.constant 0 : i32
    %c0_i32_0 = arith.constant 0 : i32
    %c0_i32_1 = arith.constant 0 : i32
    return %c0_i32, %c0_i32_0 : i32, i32
  }
  func.func @transform_3(%arg0: i32) -> (i32, i32) {
    %c0_i32 = arith.constant 0 : i32
    %c0_i32_0 = arith.constant 0 : i32
    %c0_i32_1 = arith.constant 0 : i32
    return %c0_i32, %c0_i32_0 : i32, i32
  }
  func.func @transform_4(%arg0: i32) -> (i32, i32) {
    %c0_i32 = arith.constant 0 : i32
    %c0_i32_0 = arith.constant 0 : i32
    %c0_i32_1 = arith.constant 0 : i32
    return %c0_i32, %c0_i32_0 : i32, i32
  }
  func.func @transform_5(%arg0: i32) -> (i32, i32) {
    %c0_i32 = arith.constant 0 : i32
    %c0_i32_0 = arith.constant 0 : i32
    %c0_i32_1 = arith.constant 0 : i32
    return %c0_i32, %c0_i32_0 : i32, i32
  }
  func.func @transform_6(%arg0: i32) -> (i32, i32) {
    %c0_i32 = arith.constant 0 : i32
    %c0_i32_0 = arith.constant 0 : i32
    %c0_i32_1 = arith.constant 0 : i32
    return %c0_i32, %c0_i32_0 : i32, i32
  }
  func.func @transform_7(%arg0: i32) -> (i32, i32) {
    %c0_i32 = arith.constant 0 : i32
    %c0_i32_0 = arith.constant 0 : i32
    %c0_i32_1 = arith.constant 0 : i32
    return %c0_i32, %c0_i32_0 : i32, i32
  }
  func.func @transform_8(%arg0: i32) -> (i32, i32) {
    %c0_i32 = arith.constant 0 : i32
    %c0_i32_0 = arith.constant 0 : i32
    return %arg0, %c0_i32 : i32, i32
  }
}

</mosaic_0001>

<bundles_post_ra>
// kernel: tpu_custom_call.1
= control target key start
LH: loop header
LB: loop body
LE: loop exit
PB: predicated region body
PF: predicated region fallthrough
CT: control target
= control target key end

     0   :  { %13 = vsyncpa [#allocation3], 0  ;;  %s3655_s0 = inlined_call_operand.hbm [shape: f32[512,128], index: 0, kind: input, shape index: {}]   ;;  %s3656_s1 = inlined_call_operand.hbm [shape: bf16[128,128], index: 1, kind: input, shape index: {}]   ;;  %s3657_s2 = inlined_call_operand.vmem [shape: f32[1,128], index: 2, kind: input, shape index: {}]   ;;  %s3658_s3 = inlined_call_operand.hbm [shape: bf16[128,128], index: 3, kind: input, shape index: {}]   ;;  %s3659_s4 = inlined_call_operand.vmem [shape: f32[1,128], index: 4, kind: input, shape index: {}]   ;;  %s3660_s5 = inlined_call_operand.hbm [shape: bf16[128,128], index: 5, kind: input, shape index: {}]   ;;  %s3661_s6 = inlined_call_operand.vmem [shape: f32[1,128], index: 6, kind: input, shape index: {}]   ;;  %s3662_s7 = inlined_call_operand.hbm [shape: bf16[128,128], index: 7, kind: input, shape index: {}]   ;;  %s3663_s8 = inlined_call_operand.hbm [shape: f32[512,128], index: 8, kind: output, shape index: {}]  }
   0x1   :  { %15 = vsyncpa [#allocation3 + $0x1], 0 }
   0x2   :  { %16 = vsyncpa [#allocation6], 0 }
   0x3   :  { %17 = vsyncpa [#allocation9], 0 }
   0x4   :  { %18 = vsyncpa [#allocation4], 0 }
   0x5   :  { %20 = vsyncpa [#allocation4 + $0x1], 0  ;;  %s2786_s27 = smov 0   ;;  %s2788_s28 = smov 0  }
   0x6   :  { %s2790_s29 = smov 0   ;;  %s2792_s30 = smov 0  }
   0x7 LB: > { %3685 = sst [smem:[#allocation16_spill]] %s2715_s27  ;;  %s2807_s9 = sadd.s32 4294967295, %s2727_s30   ;;  %s2727_s30 = sphi %s2792_s30, %s3740_s30   ;;  %s2723_s29 = sphi %s2790_s29, %s3739_s29   ;;  %s2719_s28 = sphi %s2788_s28, %s3738_s28   ;;  %s2715_s27 = sphi %s2786_s27, %s3737_s27  }
   0x8   : > { %s1943_s10 = sadd.s32 4294967294, %s2727_s30   ;;  %p46_p0 = scmp.ne.s32.totalorder %s2719_s28, %s2715_s27 }
   0x9   : > { %p3664_p1 = scmp.eq.s32.totalorder %s2807_s9, 0  ;;  %p223_p3 = scmp.eq.s32.totalorder %s1943_s10, 1 }
   0xa   : > { %p1944_p5 = scmp.ge.s32.totalorder %s2727_s30, 1  ;;  %p230_p7 = scmp.lt.s32.totalorder %s2727_s30, 3 }
   0xb   : > { %p2816_p4 = por %p3664_p1, %p46_p0  ;;  %p2821_p6 = por %p223_p3, %p46_p0 }
   0xc   : > { %p2826_p8 = pnand %p1944_p5, %p230_p7  ;;  %s2729_s14 = smov [#allocation5]  }
   0xd   : > { %s3686_s11 = scalar_select %p2816_p4, 1, 0 }
   0xe   : > { %s3687_s12 = scalar_select %p2821_p6, 1, 0 }
   0xf   : > { %s3689_s13 = scalar_select %p2826_p8, 1, 0 }
  0x10   : > { %3688 = sst [smem:[#allocation17_spill]] %s3687_s12  ;;  %s242_s15 = sshll.u32 %s2729_s14, 4  ;;  %s2830_s15 = int_to_ptr.vmem [resolvable:$true] %s242_s15 }
  0x11   : > { %p2310_p9 = pneg %p2826_p8  ;;  %s2730_s17 = smov [#allocation8]  }
  0x12   : > { %s274_s18 = sshll.u32 %s2730_s17, 4  ;;  %s2731_s19 = smov [#allocation7]   ;;  %s2841_s18 = int_to_ptr.vmem [resolvable:$true] %s274_s18 }
  0x13   : > { %p2837_p11 = pnand %p2310_p9, %p3664_p1  ;;  %s2843_s20 = sshll.u32 %s2731_s19, 4  ;;  %s259_s20 = int_to_ptr.vmem [resolvable:$true] %s2843_s20 }
  0x14   : > { %s2511_s23 = scalar_lea.hbm %s3656_s1, 1024 }
  0x15   : > { %p2512_p12 = scmp.ne.s32.totalorder %s3656_s1, %s2511_s23  ;;  %p2853_p13 = pneg %p2837_p11 }
  0x16   : > { %p2518_p5 = scmp.lt.u32.totalorder %s2511_s23, %s3656_s1 }
  0x17   : > { %p2514_p0 = pnand %p2853_p13, %p2512_p12 }
  0x19   : > { %p2515_p3 = pneg %p2514_p0 }
  0x1b   : > { %p2520_p7 = pnand %p2518_p5, %p2515_p3 }
  0x1d   : > { %2523 = shalt.err (!%p2520_p7)
}
  0x1e   : > { %s2524_s17 = scalar_lea.vmem %s2830_s15, 1024  ;;  %p2532_p2 = scmp.lt.s32.totalorder %s2830_s15, %s2830_s15 }
  0x1f   : > { %p2525_p9 = scmp.ne.s32.totalorder %s2830_s15, %s2524_s17  ;;  %p2533_p6 = scmp.lt.s32.totalorder %s2524_s17, %s2524_s17 }
  0x21   : > { %p2527_p10 = pnand %p2525_p9, %p2853_p13  ;;  %p2534_p12 = por %p2533_p6, %p2532_p2 }
  0x23   : > { %p2528_p1 = pneg %p2527_p10 }
  0x25   : > { %p2535_p0 = pnand %p2534_p12, %p2528_p1 }
  0x27   : > { %2538 = shalt.err (!%p2535_p0)
}
  0x28   : > { %s2732_s19 = smov 64   ;;  %s2733_s21 = smov 4  }
  0x29   : > { %2313 = dma.hbm_to_vmem [thread:$0]  (!%p2837_p11), %s3656_s1, 1024, %s2830_s15, [#allocation6], %s2732_s19, %s2732_s19, %s2733_s21  }
  0x2a   : > { %s2539_s10 = scalar_lea.hbm %s3660_s5, 1024 }
  0x2b   : > { %p2540_p1 = scmp.ne.s32.totalorder %s3660_s5, %s2539_s10  ;;  %p2546_p10 = scmp.lt.u32.totalorder %s2539_s10, %s3660_s5 }
  0x2d   : > { %p2542_p2 = pnand %p2540_p1, %p2853_p13 }
  0x2f   : > { %p2543_p6 = pneg %p2542_p2 }
  0x31   : > { %p2548_p3 = pnand %p2546_p10, %p2543_p6 }
  0x33   : > { %2551 = shalt.err (!%p2548_p3)
}
  0x34   : > { %s2552_s15 = scalar_lea.vmem %s2841_s18, 1024  ;;  %p2560_p12 = scmp.lt.s32.totalorder %s2841_s18, %s2841_s18 }
  0x35   : > { %p2553_p5 = scmp.ne.s32.totalorder %s2841_s18, %s2552_s15  ;;  %p2561_p0 = scmp.lt.s32.totalorder %s2552_s15, %s2552_s15 }
  0x37   : > { %p2555_p7 = pnand %p2553_p5, %p2853_p13  ;;  %p2562_p1 = por %p2561_p0, %p2560_p12 }
  0x39   : > { %p2556_p9 = pneg %p2555_p7 }
  0x3b   : > { %p2563_p2 = pnand %p2562_p1, %p2556_p9 }
  0x3d   : > { %2566 = shalt.err (!%p2563_p2)
}
  0x3e   : > { %2319 = dma.hbm_to_vmem [thread:$0]  (!%p2837_p11), %s3660_s5, 1024, %s2841_s18, [#allocation9], %s2732_s19, %s2732_s19, %s2733_s21  }
  0x3f   : > { %s2567_s24 = scalar_lea.hbm %s3658_s3, 1024 }
  0x40   : > { %p2568_p6 = scmp.ne.s32.totalorder %s3658_s3, %s2567_s24  ;;  %p2574_p5 = scmp.lt.u32.totalorder %s2567_s24, %s3658_s3 }
  0x42   : > { %p2570_p10 = pnand %p2568_p6, %p2853_p13 }
  0x44   : > { %p2571_p3 = pneg %p2570_p10 }
  0x46   : > { %p2576_p7 = pnand %p2574_p5, %p2571_p3 }
  0x48   : > { %2579 = shalt.err (!%p2576_p7)
}
  0x49   : > { %s2580_s15 = scalar_lea.vmem %s259_s20, 1024  ;;  %p2588_p1 = scmp.lt.s32.totalorder %s259_s20, %s259_s20 }
  0x4a   : > { %p2581_p9 = scmp.ne.s32.totalorder %s259_s20, %s2580_s15  ;;  %p2589_p2 = scmp.lt.s32.totalorder %s2580_s15, %s2580_s15 }
  0x4c   : > { %p2583_p12 = pnand %p2581_p9, %p2853_p13  ;;  %p2590_p4 = por %p2589_p2, %p2588_p1 }
  0x4e   : > { %p2584_p0 = pneg %p2583_p12 }
  0x50   : > { %p2591_p8 = pnand %p2590_p4, %p2584_p0 }
  0x52   : > { %2594 = shalt.err (!%p2591_p8)
}
  0x53   : > { %2316 = dma.hbm_to_vmem [thread:$0]  (!%p2837_p11), %s3658_s3, 1024, %s259_s20, [#allocation6], %s2732_s19, %s2732_s19, %s2733_s21  }
  0x54   : > { %s2734_s12 = smov [#allocation10]   ;;  %s2595_s25 = scalar_lea.hbm %s3662_s7, 1024 }
  0x55   : > { %s290_s22 = sshll.u32 %s2734_s12, 4  ;;  %p2596_p4 = scmp.ne.s32.totalorder %s3662_s7, %s2595_s25  ;;  %s291_s22 = int_to_ptr.vmem [resolvable:$true] %s290_s22 }
  0x56   : > { %p2602_p10 = scmp.lt.u32.totalorder %s2595_s25, %s3662_s7 }
  0x57   : > { %p2598_p8 = pnand %p2596_p4, %p2853_p13 }
  0x59   : > { %p2599_p6 = pneg %p2598_p8 }
  0x5b   : > { %p2604_p3 = pnand %p2602_p10, %p2599_p6 }
  0x5d   : > { %2607 = shalt.err (!%p2604_p3)
}
  0x5e   : > { %s2608_s20 = scalar_lea.vmem %s291_s22, 1024  ;;  %p2616_p12 = scmp.lt.s32.totalorder %s291_s22, %s291_s22 }
  0x5f   : > { %p2609_p5 = scmp.ne.s32.totalorder %s291_s22, %s2608_s20  ;;  %p2617_p0 = scmp.lt.s32.totalorder %s2608_s20, %s2608_s20 }
  0x61   : > { %p2611_p7 = pnand %p2609_p5, %p2853_p13  ;;  %p2618_p1 = por %p2617_p0, %p2616_p12 }
  0x63   : > { %p2612_p9 = pneg %p2611_p7 }
  0x65   : > { %p2619_p2 = pnand %p2618_p1, %p2612_p9 }
  0x67   : > { %2622 = shalt.err (!%p2619_p2)
}
  0x68   : > { %2322 = dma.hbm_to_vmem [thread:$0]  (!%p2837_p11), %s3662_s7, 1024, %s291_s22, [#allocation9], %s2732_s19, %s2732_s19, %s2733_s21  }
  0x69   : > { %s2947_s26 = sadd.s32 1, %s2727_s30   ;;  %s33_s16 = sadd.s32 1, %s2723_s29 }
  0x6a   : > { %s30_s12 = ssub.s32 %s2727_s30, %s2947_s26  ;;  %p40_p13 = scmp.ne.s32.totalorder %s2723_s29, %s2719_s28 }
  0x6b   : > { %p31_p4 = scmp.eq.s32.totalorder %s30_s12, 0  ;;  %p41_p8 = scmp.eq.s32.totalorder %s2727_s30, 0 }
  0x6c   : > { %p3692_p6 = scmp.eq.s32.totalorder %s2807_s9, 1  ;;  %p2335_p3 = scmp.lt.s32.totalorder %s2727_s30, 2 }
  0x6d   : > { %s2963_s24 = scalar_select %p31_p4, %s2723_s29, %s33_s16  }
  0x6e   : > { %p2957_p10 = por %p3692_p6, %p40_p13  ;;  %p42_p5 = por %p41_p8, %p40_p13 }
  0x6f   : > { %s304_s25 = sand.u32 1, %s2723_s29   ;;  %s2000_s19 = sshll.u32 %s2727_s30, 12 }
  0x70   : > { %s1950_s10 = sshll.u32 %s304_s25, 8  ;;  %s2970_s14 = scalar_lea.hbm %s3655_s0, %s2000_s19 }
  0x71   : > { %s308_s17 = scalar_lea.vmem [#allocation2], %s1950_s10  ;;  %p2974_p11 = pnand %p2335_p3, %p42_p5 }
  0x72   : > { %s315_s15 = sshll.u32 %s308_s17, 4  ;;  %s2978_s18 = scalar_lea.sflag [#allocation3], %s304_s25  ;;  %s2972_s15 = int_to_ptr.vmem [resolvable:$true] %s315_s15 }
  0x73   : > { %s2623_s27 = scalar_lea.hbm %s2970_s14, 4096  ;;  %p2625_p9 = pneg %p2974_p11 }
  0x74   : > { %p2624_p7 = scmp.ne.s32.totalorder %s2970_s14, %s2623_s27  ;;  %s2628_s10 = scalar_lea.hbm %s3655_s0, 8192 }
  0x75   : > { %p2629_p1 = scmp.lt.u32.totalorder %s2970_s14, %s3655_s0  ;;  %p2630_p2 = scmp.lt.u32.totalorder %s2628_s10, %s2623_s27 }
  0x76   : > { %p2626_p12 = pnand %p2625_p9, %p2624_p7  ;;  %p2632_p4 = scmp.lt.u32.totalorder %s2623_s27, %s2970_s14 }
  0x77   : > { %p2631_p13 = por %p2630_p2, %p2629_p1 }
  0x78   : > { %p2627_p0 = pneg %p2626_p12 }
  0x79   : > { %p2633_p8 = por %p2632_p4, %p2631_p13 }
  0x7b   : > { %p2634_p6 = pnand %p2633_p8, %p2627_p0 }
  0x7d   : > { %2637 = shalt.err (!%p2634_p6)
}
  0x7e   : > { %s2638_s25 = scalar_lea.vmem %s2972_s15, 4096  ;;  %s2735_s22 = smov [#allocation2]  }
  0x7f   : > { %p2639_p3 = scmp.ne.s32.totalorder %s2972_s15, %s2638_s25  ;;  %s2643_s17 = sshll.u32 %s2735_s22, 4  ;;  %s2644_s17 = int_to_ptr.vmem [resolvable:$false] %s2643_s17 }
  0x80   : > { %s2645_s16 = scalar_lea.vmem %s2644_s17, 8192  ;;  %p2646_p12 = scmp.lt.s32.totalorder %s2972_s15, %s2644_s17 }
  0x81   : > { %p2641_p5 = pnand %p2639_p3, %p2625_p9  ;;  %p2647_p1 = scmp.lt.s32.totalorder %s2645_s16, %s2638_s25 }
  0x83   : > { %p2642_p7 = pneg %p2641_p5  ;;  %p2648_p2 = por %p2647_p1, %p2646_p12 }
  0x85   : > { %p2649_p13 = pnand %p2648_p2, %p2642_p7 }
  0x87   : > { %2652 = shalt.err (!%p2649_p13)
}
  0x88   : > { %s2736_s27 = smov 128   ;;  %s2737_s12 = smov 8  }
  0x89   : > { %2326 = dma.hbm_to_vmem [thread:$0]  (!%p2974_p11), %s2970_s14, 4096, %s2972_s15, %s2978_s18, %s2736_s27, %s2736_s27, %s2737_s12  }
  0x8a   : > { %p3695_p9 = scmp.ne.s32.totalorder %s3689_s13, 0 }
  0x8c   : > { %327 = sbr.rel (%p3695_p9) target bundleno = 1185 (0x4a1), region = 52 }
  0x93   : > { %s3009_s10 = sand.u32 1, %s2719_s28   ;;  %p3696_p0 = scmp.ne.s32.totalorder %s3686_s11, 0 }
  0x94   : > { %s1954_s19 = sshll.u32 %s3009_s10, 8  ;;  %s330_s21 = scalar_lea.sflag [#allocation3], %s3009_s10 }
  0x95   : > { %s3015_s25 = scalar_lea.vmem [#allocation2], %s1954_s19 }
  0x96   : > { %2698 = dma.done.wait (%p3696_p0), %s330_s21, 4096  }
  0x97   : > { %2700 = vsyncadd (%p3696_p0), %s330_s21, 4294963200  ;;  %p3697_p11 = scmp.eq.s32.totalorder %s2807_s9, 0 }
  0x99   : > { %2702 = dma.done.wait (%p3697_p11), [#allocation6], 2048   ;;  %p3698_p4 = pmov %p3697_p11 }
  0x9b   : > { %2704 = vsyncadd (%p3698_p4), [#allocation6], 4294965248  ;;  %p3699_p8 = pmov %p3698_p4 }
  0x9c   : > { %p3700_p6 = pmov %p3698_p4 }
  0x9d   : > { %2706 = dma.done.wait (%p3699_p8), [#allocation9], 2048  }
  0x9e   : > { %2708 = vsyncadd (%p3700_p6), [#allocation9], 4294965248  ;;  %v2383_v0 = vld [vmem:[#allocation5] sm:$0xff]   ;;  %v2384_v1 = vld [vmem:[#allocation5 + $0x8] sm:$0xff]   ;;  %s3512_s22 = scalar_lea.vmem [#allocation11], %s1954_s19  ;;  %s2001_s17 = sshll.u32 %s2807_s9, 12 }
  0x9f   : > { %2098 = vmatprep.subr.bf16.mxu0 %v2383_v0  ;;  %v2385_v2 = vld [vmem:[#allocation5 + $0x10] sm:$0xff]   ;;  %v2386_v3 = vld [vmem:[#allocation5 + $0x18] sm:$0xff]   ;;  %v385_v4 = vld [vmem:[%s3015_s25] sm:$0xff]  ;;  %s1832_s16 = sshll.u32 %s3512_s22, 4  ;;  %s3605_s9 = scalar_lea.hbm %s3663_s8, %s2001_s17  ;;  %s3607_s16 = int_to_ptr.vmem [resolvable:$true] %s1832_s16 }
  0xa0   : > { %2099 = vmatpush3.bf16.msra.mxu0 %v2383_v0  ;;  %v386_v5 = vld [vmem:[%s3015_s25 + $0x8] sm:$0xff]  ;;  %v2387_v7 = vld [vmem:[#allocation5 + $0x20] sm:$0xff]   ;;  %v2389_v9 = vld [vmem:[#allocation5 + $0x30] sm:$0xff]   ;;  %s1819_s19 = scalar_lea.sflag [#allocation4], %s3009_s10  ;;  %s2653_s21 = scalar_lea.vmem %s3607_s16, 4096 }
  0xa1   : > { %2100 = vmatprep.subr.bf16.mxu0 %v2384_v1  ;;  %v417_v6 = vpack.c.bf16 %v386_v5, %v385_v4  ;;  %v2388_v8 = vld [vmem:[#allocation5 + $0x28] sm:$0xff]   ;;  %v2391_v10 = vld [vmem:[#allocation7] sm:$0xff]   ;;  %v2393_v12 = vld [vmem:[#allocation7 + $0x10] sm:$0xff]   ;;  %p2654_p3 = scmp.ne.s32.totalorder %s3607_s16, %s2653_s21  ;;  %s2738_s11 = smov [#allocation11]  }
  0xa2   : > { %v2392_v11 = vld [vmem:[#allocation7 + $0x8] sm:$0xff]   ;;  %2146 = vmatprep.subr.bf16.mxu1 %v2391_v10  ;;  %v2390_v13 = vld [vmem:[#allocation5 + $0x38] sm:$0xff]   ;;  %v387_v14 = vld [vmem:[%s3015_s25 + $0x10] sm:$0xff]  ;;  %s2657_s13 = sshll.u32 %s2738_s11, 4  ;;  %s2658_s13 = int_to_ptr.vmem [resolvable:$false] %s2657_s13 }
  0xa3   : > { %2114 = vmatprep.mubr.bf16.mxu0 %v417_v6  ;;  %2147 = vmatpush3.bf16.msra.mxu1 %v2391_v10  ;;  %v388_v15 = vld [vmem:[%s3015_s25 + $0x18] sm:$0xff]  ;;  %v389_v17 = vld [vmem:[%s3015_s25 + $0x20] sm:$0xff]  ;;  %v390_v18 = vld [vmem:[%s3015_s25 + $0x28] sm:$0xff]  ;;  %p2655_p5 = pnand %p2654_p3, %p2957_p10  ;;  %s2659_s14 = scalar_lea.vmem %s2658_s13, 8192 }
  0xa4   : > { %2101 = vmatpush3.bf16.msra.mxu0 %v2384_v1  ;;  %2148 = vmatprep.subr.bf16.mxu1 %v2392_v11  ;;  %v2394_v16 = vld [vmem:[#allocation7 + $0x18] sm:$0xff]   ;;  %v2395_v19 = vld [vmem:[#allocation7 + $0x20] sm:$0xff]   ;;  %v418_v20 = vpack.c.bf16 %v388_v15, %v387_v14  ;;  %v419_v21 = vpack.c.bf16 %v390_v18, %v389_v17  ;;  %v391_v22 = vld [vmem:[%s3015_s25 + $0x30] sm:$0xff]  ;;  %p2660_p12 = scmp.lt.s32.totalorder %s3607_s16, %s2658_s13  ;;  %p2661_p1 = scmp.lt.s32.totalorder %s2659_s14, %s2653_s21 }
  0xa5   : > { %2102 = vmatprep.subr.bf16.mxu0 %v2385_v2  ;;  %v392_v23 = vld [vmem:[%s3015_s25 + $0x38] sm:$0xff]  ;;  %v2396_v24 = vld [vmem:[#allocation7 + $0x28] sm:$0xff]   ;;  %v393_v25 = vld [vmem:[%s3015_s25 + $0x40] sm:$0xff]  ;;  %p2656_p7 = pneg %p2655_p5 }
  0xa6   : > { %v394_v26 = vld [vmem:[%s3015_s25 + $0x48] sm:$0xff]  ;;  %v420_v27 = vpack.c.bf16 %v392_v23, %v391_v22  ;;  %v395_v29 = vld [vmem:[%s3015_s25 + $0x50] sm:$0xff]  ;;  %v396_v30 = vld [vmem:[%s3015_s25 + $0x58] sm:$0xff]  ;;  %p2662_p2 = por %p2661_p1, %p2660_p12 }
  0xa7   : > { %2149 = vmatpush3.bf16.msra.mxu1 %v2392_v11  ;;  %v421_v28 = vpack.c.bf16 %v394_v26, %v393_v25  ;;  %v397_v31 = vld [vmem:[%s3015_s25 + $0x60] sm:$0xff]  ;;  %v398_v32 = vld [vmem:[%s3015_s25 + $0x68] sm:$0xff]  ;;  %v422_v33 = vpack.c.bf16 %v396_v30, %v395_v29  ;;  %v399_v35 = vld [vmem:[%s3015_s25 + $0x70] sm:$0xff] }
  0xa8   : > { %2103 = vmatpush3.bf16.msra.mxu0 %v2385_v2  ;;  %2150 = vmatprep.subr.bf16.mxu1 %v2393_v12  ;;  %v423_v34 = vpack.c.bf16 %v398_v32, %v397_v31  ;;  %v400_v36 = vld [vmem:[%s3015_s25 + $0x78] sm:$0xff]  ;;  %v401_v37 = vld [vmem:[%s3015_s25 + $0x80] sm:$0xff]  ;;  %v402_v38 = vld [vmem:[%s3015_s25 + $0x88] sm:$0xff]  ;;  %p2663_p13 = pnand %p2662_p2, %p2656_p7 }
  0xa9   : > { %2104 = vmatprep.subr.bf16.mxu0 %v2386_v3  ;;  %v424_v39 = vpack.c.bf16 %v400_v36, %v399_v35  ;;  %v425_v40 = vpack.c.bf16 %v402_v38, %v401_v37  ;;  %v403_v41 = vld [vmem:[%s3015_s25 + $0x90] sm:$0xff]  ;;  %v404_v42 = vld [vmem:[%s3015_s25 + $0x98] sm:$0xff]  ;;  %v405_v43 = vld [vmem:[%s3015_s25 + $0xa0] sm:$0xff] }
  0xaa   : > { %v406_v44 = vld [vmem:[%s3015_s25 + $0xa8] sm:$0xff]  ;;  %v426_v45 = vpack.c.bf16 %v404_v42, %v403_v41  ;;  %v407_v47 = vld [vmem:[%s3015_s25 + $0xb0] sm:$0xff]  ;;  %v408_v48 = vld [vmem:[%s3015_s25 + $0xb8] sm:$0xff] }
  0xab   : > { %2151 = vmatpush3.bf16.msra.mxu1 %v2393_v12  ;;  %v427_v46 = vpack.c.bf16 %v406_v44, %v405_v43  ;;  %v409_v49 = vld [vmem:[%s3015_s25 + $0xc0] sm:$0xff]  ;;  %v410_v50 = vld [vmem:[%s3015_s25 + $0xc8] sm:$0xff]  ;;  %v428_v51 = vpack.c.bf16 %v408_v48, %v407_v47  ;;  %v411_v53 = vld [vmem:[%s3015_s25 + $0xd0] sm:$0xff] }
  0xac   : > { %2105 = vmatpush3.bf16.msra.mxu0 %v2386_v3  ;;  %2152 = vmatprep.subr.bf16.mxu1 %v2394_v16  ;;  %v429_v52 = vpack.c.bf16 %v410_v50, %v409_v49  ;;  %v412_v54 = vld [vmem:[%s3015_s25 + $0xd8] sm:$0xff]  ;;  %v413_v55 = vld [vmem:[%s3015_s25 + $0xe0] sm:$0xff]  ;;  %v414_v56 = vld [vmem:[%s3015_s25 + $0xe8] sm:$0xff] }
  0xad   : > { %2106 = vmatprep.subr.bf16.mxu0 %v2387_v7  ;;  %v430_v57 = vpack.c.bf16 %v412_v54, %v411_v53  ;;  %v431_v58 = vpack.c.bf16 %v414_v56, %v413_v55  ;;  %v415_v59 = vld [vmem:[%s3015_s25 + $0xf0] sm:$0xff]  ;;  %v416_v60 = vld [vmem:[%s3015_s25 + $0xf8] sm:$0xff]  ;;  %v2399_v0 = vld [vmem:[#allocation8] sm:$0xff]  }
  0xae   : > { %v432_v61 = vpack.c.bf16 %v416_v60, %v415_v59  ;;  %v2397_v62 = vld [vmem:[#allocation7 + $0x30] sm:$0xff]   ;;  %v2398_v63 = vld [vmem:[#allocation7 + $0x38] sm:$0xff]   ;;  %v2400_v1 = vld [vmem:[#allocation8 + $0x8] sm:$0xff]  }
  0xaf   : > { %2153 = vmatpush3.bf16.msra.mxu1 %v2394_v16  ;;  %v2401_v2 = vld [vmem:[#allocation8 + $0x10] sm:$0xff]   ;;  %v2402_v3 = vld [vmem:[#allocation8 + $0x18] sm:$0xff]   ;;  %v2403_v4 = vld [vmem:[#allocation8 + $0x20] sm:$0xff]  }
  0xb0   : > { %2107 = vmatpush3.bf16.msra.mxu0 %v2387_v7  ;;  %2154 = vmatprep.subr.bf16.mxu1 %v2395_v19  ;;  %v2404_v5 = vld [vmem:[#allocation8 + $0x28] sm:$0xff]   ;;  %v2405_v6 = vld [vmem:[#allocation8 + $0x30] sm:$0xff]   ;;  %v3064_v7 = vld [vmem:[%s3657_s2] ss:$0 sm:$0xff] }
  0xb1   : > { %2108 = vmatprep.subr.bf16.mxu0 %v2388_v8 }
  0xb3   : > { %2155 = vmatpush3.bf16.msra.mxu1 %v2395_v19 }
  0xb4   : > { %2109 = vmatpush3.bf16.msra.mxu0 %v2388_v8  ;;  %2156 = vmatprep.subr.bf16.mxu1 %v2396_v24 }
  0xb5   : > { %2110 = vmatprep.subr.bf16.mxu0 %v2389_v9 }
  0xb7   : > { %2157 = vmatpush3.bf16.msra.mxu1 %v2396_v24 }
  0xb8   : > { %2111 = vmatpush3.bf16.msra.mxu0 %v2389_v9  ;;  %2158 = vmatprep.subr.bf16.mxu1 %v2397_v62 }
  0xb9   : > { %2112 = vmatprep.subr.bf16.mxu0 %v2390_v13 }
  0xbb   : > { %2159 = vmatpush3.bf16.msra.mxu1 %v2397_v62 }
  0xbc   : > { %2113 = vmatpush3.bf16.msra.mxu0 %v2390_v13  ;;  %2160 = vmatprep.subr.bf16.mxu1 %v2398_v63 }
  0xbd   : > { %2194 = vmatprep.subr.bf16.mxu0 %v2399_v0 }
  0xbf   : > { %2115 = vmatmul.mubr.bf16.vlgmr.msra.gmra.mrb[0].mxu0 %v418_v20  ;;  %2161 = vmatpush3.bf16.msra.mxu1 %v2398_v63 }
  0xc0   : > { %2118 = vmatprep.mubr.bf16.mxu0 %v419_v21  ;;  %2195 = vmatpush3.bf16.msra.mxu0 %v2399_v0 }
  0xc1   : > { %2196 = vmatprep.subr.bf16.mxu0 %v2400_v1 }
  0xc4   : > { %2197 = vmatpush3.bf16.msra.mxu0 %v2400_v1 }
  0xc5   : > { %2198 = vmatprep.subr.bf16.mxu0 %v2401_v2 }
  0xc7   : > { %2119 = vmatmul.mubr.bf16.gmra.mrb[4].mxu0 %v420_v27 }
  0xc8   : > { %2122 = vmatprep.mubr.bf16.mxu0 %v421_v28  ;;  %2199 = vmatpush3.bf16.msra.mxu0 %v2401_v2 }
  0xc9   : > { %2200 = vmatprep.subr.bf16.mxu0 %v2402_v3 }
  0xcc   : > { %2201 = vmatpush3.bf16.msra.mxu0 %v2402_v3 }
  0xcd   : > { %2202 = vmatprep.subr.bf16.mxu0 %v2403_v4 }
  0xcf   : > { %2123 = vmatmul.mubr.bf16.gmra.mrb[8].mxu0 %v422_v33 }
  0xd0   : > { %2126 = vmatprep.mubr.bf16.mxu0 %v423_v34  ;;  %2203 = vmatpush3.bf16.msra.mxu0 %v2403_v4 }
  0xd1   : > { %2204 = vmatprep.subr.bf16.mxu0 %v2404_v5 }
  0xd4   : > { %2205 = vmatpush3.bf16.msra.mxu0 %v2404_v5 }
  0xd5   : > { %2206 = vmatprep.subr.bf16.mxu0 %v2405_v6 }
  0xd7   : > { %2127 = vmatmul.mubr.bf16.gmra.mrb[12].mxu0 %v424_v39 }
  0xd8   : > { %2130 = vmatprep.mubr.bf16.mxu0 %v425_v40  ;;  %2207 = vmatpush3.bf16.msra.mxu0 %v2405_v6 }
  0xdf   : > { %2131 = vmatmul.mubr.bf16.gmra.mrb[16].mxu0 %v426_v45 }
  0xe0   : > { %2134 = vmatprep.mubr.bf16.mxu0 %v427_v46 }
  0xe7   : > { %2135 = vmatmul.mubr.bf16.gmra.mrb[20].mxu0 %v428_v51 }
  0xe8   : > { %2138 = vmatprep.mubr.bf16.mxu0 %v429_v52 }
  0xef   : > { %2139 = vmatmul.mubr.bf16.gmra.mrb[24].mxu0 %v430_v57 }
  0xf0   : > { %2142 = vmatprep.mubr.bf16.mxu0 %v431_v58 }
  0xf7   : > { %2143 = vmatmul.mubr.bf16.gmra.mrb[28].mxu0 %v432_v61 }
 0x192   : > { %v2116_v8 = vpop.f32.mrb[0].mxu0 }
 0x193   : > { %v547_v9 = vadd.f32 %v2116_v8, %v3064_v7  ;;  %v538_v10 = vpop.f32.mrb[1].mxu0 }
 0x194   : > { %v539_v11 = vadd.f32 %v3064_v7, %v538_v10  ;;  %v2117_v12 = vpop.f32.mrb[2].mxu0 }
 0x195   : > { %v550_v13 = vadd.f32 %v2117_v12, %v3064_v7  ;;  %v541_v14 = vpop.f32.mrb[3].mxu0  ;;  %v667_v16 = vmax.f32 %v547_v9, 0.0 }
 0x196   : > { %v542_v15 = vadd.f32 %v3064_v7, %v541_v14  ;;  %v665_v18 = vmax.f32 %v539_v11, 0.0 }
 0x197   : > { %v668_v17 = vmax.f32 %v550_v13, 0.0 }
 0x198   : > { %v666_v19 = vmax.f32 %v542_v15, 0.0 }
 0x199   : > { %v698_v20 = vpack.c.bf16 %v668_v17, %v667_v16 }
 0x19a   : > { %v2120_v21 = vpop.f32.mrb[4].mxu0  ;;  %v697_v22 = vpack.c.bf16 %v666_v19, %v665_v18 }
 0x19b   : > { %v563_v23 = vadd.f32 %v2120_v21, %v3064_v7  ;;  %v554_v24 = vpop.f32.mrb[5].mxu0 }
 0x19c   : > { %v555_v25 = vadd.f32 %v3064_v7, %v554_v24  ;;  %v2121_v26 = vpop.f32.mrb[6].mxu0  ;;  %2162 = vmatprep.mubr.bf16.mxu1 %v697_v22 }
 0x19d   : > { %v566_v27 = vadd.f32 %v2121_v26, %v3064_v7  ;;  %v557_v28 = vpop.f32.mrb[7].mxu0  ;;  %2163 = vmatmul.mubr.bf16.vlgmr.msra.gmra.mrb[0].mxu1 %v698_v20  ;;  %v671_v30 = vmax.f32 %v563_v23, 0.0 }
 0x19e   : > { %v558_v29 = vadd.f32 %v3064_v7, %v557_v28  ;;  %v669_v32 = vmax.f32 %v555_v25, 0.0 }
 0x19f   : > { %v672_v31 = vmax.f32 %v566_v27, 0.0 }
 0x1a0   : > { %v670_v33 = vmax.f32 %v558_v29, 0.0 }
 0x1a1   : > { %v700_v34 = vpack.c.bf16 %v672_v31, %v671_v30 }
 0x1a2   : > { %v699_v35 = vpack.c.bf16 %v670_v33, %v669_v32  ;;  %v2124_v36 = vpop.f32.mrb[8].mxu0 }
 0x1a3   : > { %v579_v37 = vadd.f32 %v2124_v36, %v3064_v7  ;;  %v570_v38 = vpop.f32.mrb[9].mxu0 }
 0x1a4   : > { %v571_v39 = vadd.f32 %v3064_v7, %v570_v38  ;;  %v2125_v40 = vpop.f32.mrb[10].mxu0  ;;  %2166 = vmatprep.mubr.bf16.mxu1 %v699_v35 }
 0x1a5   : > { %v582_v41 = vadd.f32 %v2125_v40, %v3064_v7  ;;  %v573_v42 = vpop.f32.mrb[11].mxu0  ;;  %2167 = vmatmul.mubr.bf16.gmra.mrb[4].mxu1 %v700_v34  ;;  %v675_v44 = vmax.f32 %v579_v37, 0.0 }
 0x1a6   : > { %v574_v43 = vadd.f32 %v3064_v7, %v573_v42  ;;  %v673_v46 = vmax.f32 %v571_v39, 0.0 }
 0x1a7   : > { %v676_v45 = vmax.f32 %v582_v41, 0.0 }
 0x1a8   : > { %v674_v47 = vmax.f32 %v574_v43, 0.0 }
 0x1a9   : > { %v702_v48 = vpack.c.bf16 %v676_v45, %v675_v44 }
 0x1aa   : > { %v701_v49 = vpack.c.bf16 %v674_v47, %v673_v46  ;;  %v2128_v50 = vpop.f32.mrb[12].mxu0 }
 0x1ab   : > { %v595_v51 = vadd.f32 %v2128_v50, %v3064_v7  ;;  %v586_v52 = vpop.f32.mrb[13].mxu0 }
 0x1ac   : > { %v587_v53 = vadd.f32 %v3064_v7, %v586_v52  ;;  %v2129_v54 = vpop.f32.mrb[14].mxu0  ;;  %2170 = vmatprep.mubr.bf16.mxu1 %v701_v49 }
 0x1ad   : > { %v598_v55 = vadd.f32 %v2129_v54, %v3064_v7  ;;  %v589_v56 = vpop.f32.mrb[15].mxu0  ;;  %2171 = vmatmul.mubr.bf16.gmra.mrb[8].mxu1 %v702_v48  ;;  %v679_v58 = vmax.f32 %v595_v51, 0.0 }
 0x1ae   : > { %v590_v57 = vadd.f32 %v3064_v7, %v589_v56  ;;  %v677_v60 = vmax.f32 %v587_v53, 0.0 }
 0x1af   : > { %v680_v59 = vmax.f32 %v598_v55, 0.0 }
 0x1b0   : > { %v678_v61 = vmax.f32 %v590_v57, 0.0  ;;  %v2406_v57 = vld [vmem:[#allocation8 + $0x38] sm:$0xff]  }
 0x1b1   : > { %v704_v62 = vpack.c.bf16 %v680_v59, %v679_v58  ;;  %2208 = vmatprep.subr.bf16.mxu0 %v2406_v57  ;;  %v2407_v58 = vld [vmem:[#allocation10] sm:$0xff]   ;;  %v2408_v59 = vld [vmem:[#allocation10 + $0x8] sm:$0xff]  }
 0x1b2   : > { %v703_v63 = vpack.c.bf16 %v678_v61, %v677_v60  ;;  %v2132_v0 = vpop.f32.mrb[16].mxu0  ;;  %2209 = vmatpush3.bf16.msra.mxu0 %v2406_v57  ;;  %2242 = vmatprep.subr.bf16.mxu1 %v2407_v58  ;;  %v2409_v60 = vld [vmem:[#allocation10 + $0x10] sm:$0xff]  }
 0x1b3   : > { %v611_v1 = vadd.f32 %v2132_v0, %v3064_v7  ;;  %v602_v2 = vpop.f32.mrb[17].mxu0  ;;  %2243 = vmatpush3.bf16.msra.mxu1 %v2407_v58 }
 0x1b4   : > { %v603_v3 = vadd.f32 %v3064_v7, %v602_v2  ;;  %v2133_v4 = vpop.f32.mrb[18].mxu0  ;;  %2174 = vmatprep.mubr.bf16.mxu1 %v703_v63  ;;  %2244 = vmatprep.subr.bf16.mxu1 %v2408_v59 }
 0x1b5   : > { %v614_v5 = vadd.f32 %v2133_v4, %v3064_v7  ;;  %v605_v6 = vpop.f32.mrb[19].mxu0  ;;  %2175 = vmatmul.mubr.bf16.gmra.mrb[12].mxu1 %v704_v62  ;;  %v683_v9 = vmax.f32 %v611_v1, 0.0  ;;  %v3101_v62 = vld [vmem:[%s3659_s4] ss:$0 sm:$0xff] }
 0x1b6   : > { %v606_v8 = vadd.f32 %v3064_v7, %v605_v6  ;;  %v681_v11 = vmax.f32 %v603_v3, 0.0 }
 0x1b7   : > { %v684_v10 = vmax.f32 %v614_v5, 0.0  ;;  %2245 = vmatpush3.bf16.msra.mxu1 %v2408_v59 }
 0x1b8   : > { %v682_v12 = vmax.f32 %v606_v8, 0.0  ;;  %2246 = vmatprep.subr.bf16.mxu1 %v2409_v60 }
 0x1b9   : > { %v706_v13 = vpack.c.bf16 %v684_v10, %v683_v9 }
 0x1ba   : > { %v705_v14 = vpack.c.bf16 %v682_v12, %v681_v11  ;;  %v2136_v15 = vpop.f32.mrb[20].mxu0 }
 0x1bb   : > { %v627_v16 = vadd.f32 %v2136_v15, %v3064_v7  ;;  %v618_v17 = vpop.f32.mrb[21].mxu0  ;;  %2247 = vmatpush3.bf16.msra.mxu1 %v2409_v60 }
 0x1bc   : > { %v619_v18 = vadd.f32 %v3064_v7, %v618_v17  ;;  %v2137_v19 = vpop.f32.mrb[22].mxu0  ;;  %2178 = vmatprep.mubr.bf16.mxu1 %v705_v14 }
 0x1bd   : > { %v630_v20 = vadd.f32 %v2137_v19, %v3064_v7  ;;  %v621_v21 = vpop.f32.mrb[23].mxu0  ;;  %2179 = vmatmul.mubr.bf16.gmra.mrb[16].mxu1 %v706_v13  ;;  %v687_v23 = vmax.f32 %v627_v16, 0.0 }
 0x1be   : > { %v622_v22 = vadd.f32 %v3064_v7, %v621_v21  ;;  %v685_v25 = vmax.f32 %v619_v18, 0.0 }
 0x1bf   : > { %v688_v24 = vmax.f32 %v630_v20, 0.0 }
 0x1c0   : > { %v686_v26 = vmax.f32 %v622_v22, 0.0 }
 0x1c1   : > { %v708_v27 = vpack.c.bf16 %v688_v24, %v687_v23 }
 0x1c2   : > { %v707_v28 = vpack.c.bf16 %v686_v26, %v685_v25  ;;  %v2140_v29 = vpop.f32.mrb[24].mxu0 }
 0x1c3   : > { %v643_v30 = vadd.f32 %v2140_v29, %v3064_v7  ;;  %v634_v31 = vpop.f32.mrb[25].mxu0 }
 0x1c4   : > { %v635_v32 = vadd.f32 %v3064_v7, %v634_v31  ;;  %v2141_v33 = vpop.f32.mrb[26].mxu0  ;;  %2182 = vmatprep.mubr.bf16.mxu1 %v707_v28 }
 0x1c5   : > { %v646_v34 = vadd.f32 %v2141_v33, %v3064_v7  ;;  %v637_v35 = vpop.f32.mrb[27].mxu0  ;;  %2183 = vmatmul.mubr.bf16.gmra.mrb[20].mxu1 %v708_v27  ;;  %v691_v37 = vmax.f32 %v643_v30, 0.0 }
 0x1c6   : > { %v638_v36 = vadd.f32 %v3064_v7, %v637_v35  ;;  %v689_v39 = vmax.f32 %v635_v32, 0.0 }
 0x1c7   : > { %v692_v38 = vmax.f32 %v646_v34, 0.0 }
 0x1c8   : > { %v690_v40 = vmax.f32 %v638_v36, 0.0 }
 0x1c9   : > { %v710_v41 = vpack.c.bf16 %v692_v38, %v691_v37 }
 0x1ca   : > { %v709_v42 = vpack.c.bf16 %v690_v40, %v689_v39  ;;  %v2144_v43 = vpop.f32.mrb[28].mxu0 }
 0x1cb   : > { %v659_v44 = vadd.f32 %v2144_v43, %v3064_v7  ;;  %v650_v45 = vpop.f32.mrb[29].mxu0 }
 0x1cc   : > { %v651_v46 = vadd.f32 %v3064_v7, %v650_v45  ;;  %v2145_v47 = vpop.f32.mrb[30].mxu0  ;;  %2186 = vmatprep.mubr.bf16.mxu1 %v709_v42 }
 0x1cd   : > { %v662_v48 = vadd.f32 %v2145_v47, %v3064_v7  ;;  %v653_v49 = vpop.f32.mrb[31].mxu0  ;;  %2187 = vmatmul.mubr.bf16.gmra.mrb[24].mxu1 %v710_v41  ;;  %v695_v51 = vmax.f32 %v659_v44, 0.0 }
 0x1ce   : > { %v654_v50 = vadd.f32 %v3064_v7, %v653_v49  ;;  %v693_v53 = vmax.f32 %v651_v46, 0.0  ;;  %v2410_v7 = vld [vmem:[#allocation10 + $0x18] sm:$0xff]  }
 0x1cf   : > { %v696_v52 = vmax.f32 %v662_v48, 0.0  ;;  %2248 = vmatprep.subr.bf16.mxu1 %v2410_v7 }
 0x1d0   : > { %v694_v54 = vmax.f32 %v654_v50, 0.0  ;;  %2249 = vmatpush3.bf16.msra.mxu1 %v2410_v7 }
 0x1d1   : > { %v712_v55 = vpack.c.bf16 %v696_v52, %v695_v51 }
 0x1d2   : > { %v711_v56 = vpack.c.bf16 %v694_v54, %v693_v53 }
 0x1d4   : > { %2190 = vmatprep.mubr.bf16.mxu1 %v711_v56 }
 0x1d5   : > { %2191 = vmatmul.mubr.bf16.gmra.mrb[28].mxu1 %v712_v55 }
 0x270   : > { %v2164_v61 = vpop.f32.mrb[0].mxu1 }
 0x271   : > { %v818_v63 = vpop.f32.mrb[1].mxu1  ;;  %v3113_v5 = vadd.f32 %v2164_v61, %v3101_v62 }
 0x272   : > { %v2165_v0 = vpop.f32.mrb[2].mxu1  ;;  %v3107_v3 = vadd.f32 %v3101_v62, %v818_v63 }
 0x273   : > { %v3104_v1 = vadd.f32 %v2165_v0, %v3101_v62  ;;  %v821_v2 = vpop.f32.mrb[3].mxu1 }
 0x274   : > { %v3110_v4 = vadd.f32 %v3101_v62, %v821_v2 }
 0x275   : > { %v946_v8 = vpack.c.bf16 %v3104_v1, %v3113_v5 }
 0x276   : > { %v945_v6 = vpack.c.bf16 %v3110_v4, %v3107_v3 }
 0x278   : > { %v2168_v9 = vpop.f32.mrb[4].mxu1  ;;  %2210 = vmatprep.mubr.bf16.mxu0 %v945_v6 }
 0x279   : > { %v834_v10 = vpop.f32.mrb[5].mxu1  ;;  %2211 = vmatmul.mubr.bf16.vlgmr.msra.gmra.mrb[32].mxu0 %v946_v8  ;;  %v3129_v16 = vadd.f32 %v2168_v9, %v3101_v62 }
 0x27a   : > { %v2169_v11 = vpop.f32.mrb[6].mxu1  ;;  %v3123_v14 = vadd.f32 %v3101_v62, %v834_v10 }
 0x27b   : > { %v3120_v12 = vadd.f32 %v2169_v11, %v3101_v62  ;;  %v837_v13 = vpop.f32.mrb[7].mxu1 }
 0x27c   : > { %v3126_v15 = vadd.f32 %v3101_v62, %v837_v13 }
 0x27d   : > { %v948_v18 = vpack.c.bf16 %v3120_v12, %v3129_v16 }
 0x27e   : > { %v947_v17 = vpack.c.bf16 %v3126_v15, %v3123_v14 }
 0x280   : > { %v2172_v19 = vpop.f32.mrb[8].mxu1  ;;  %2214 = vmatprep.mubr.bf16.mxu0 %v947_v17 }
 0x281   : > { %v850_v20 = vpop.f32.mrb[9].mxu1  ;;  %2215 = vmatmul.mubr.bf16.gmra.mrb[36].mxu0 %v948_v18  ;;  %v3145_v26 = vadd.f32 %v2172_v19, %v3101_v62 }
 0x282   : > { %v2173_v21 = vpop.f32.mrb[10].mxu1  ;;  %v3139_v24 = vadd.f32 %v3101_v62, %v850_v20 }
 0x283   : > { %v3136_v22 = vadd.f32 %v2173_v21, %v3101_v62  ;;  %v853_v23 = vpop.f32.mrb[11].mxu1 }
 0x284   : > { %v3142_v25 = vadd.f32 %v3101_v62, %v853_v23 }
 0x285   : > { %v950_v28 = vpack.c.bf16 %v3136_v22, %v3145_v26 }
 0x286   : > { %v949_v27 = vpack.c.bf16 %v3142_v25, %v3139_v24 }
 0x288   : > { %v2176_v29 = vpop.f32.mrb[12].mxu1  ;;  %2218 = vmatprep.mubr.bf16.mxu0 %v949_v27 }
 0x289   : > { %v866_v30 = vpop.f32.mrb[13].mxu1  ;;  %2219 = vmatmul.mubr.bf16.gmra.mrb[40].mxu0 %v950_v28  ;;  %v3161_v36 = vadd.f32 %v2176_v29, %v3101_v62  ;;  %v2411_v28 = vld [vmem:[#allocation10 + $0x20] sm:$0xff]   ;;  %v2412_v29 = vld [vmem:[#allocation10 + $0x28] sm:$0xff]  }
 0x28a   : > { %v2177_v31 = vpop.f32.mrb[14].mxu1  ;;  %v3155_v34 = vadd.f32 %v3101_v62, %v866_v30  ;;  %2250 = vmatprep.subr.bf16.mxu1 %v2411_v28  ;;  %v2413_v30 = vld [vmem:[#allocation10 + $0x30] sm:$0xff]  }
 0x28b   : > { %v3152_v32 = vadd.f32 %v2177_v31, %v3101_v62  ;;  %v869_v33 = vpop.f32.mrb[15].mxu1  ;;  %2251 = vmatpush3.bf16.msra.mxu1 %v2411_v28  ;;  %v2414_v31 = vld [vmem:[#allocation10 + $0x38] sm:$0xff]  }
 0x28c   : > { %v3158_v35 = vadd.f32 %v3101_v62, %v869_v33  ;;  %2252 = vmatprep.subr.bf16.mxu1 %v2412_v29 }
 0x28d   : > { %v952_v38 = vpack.c.bf16 %v3152_v32, %v3161_v36 }
 0x28e   : > { %v951_v37 = vpack.c.bf16 %v3158_v35, %v3155_v34 }
 0x28f   : > { %2253 = vmatpush3.bf16.msra.mxu1 %v2412_v29 }
 0x290   : > { %v2180_v39 = vpop.f32.mrb[16].mxu1  ;;  %2222 = vmatprep.mubr.bf16.mxu0 %v951_v37  ;;  %2254 = vmatprep.subr.bf16.mxu1 %v2413_v30 }
 0x291   : > { %v882_v40 = vpop.f32.mrb[17].mxu1  ;;  %2223 = vmatmul.mubr.bf16.gmra.mrb[44].mxu0 %v952_v38  ;;  %v3177_v46 = vadd.f32 %v2180_v39, %v3101_v62 }
 0x292   : > { %v2181_v41 = vpop.f32.mrb[18].mxu1  ;;  %v3171_v44 = vadd.f32 %v3101_v62, %v882_v40 }
 0x293   : > { %v3168_v42 = vadd.f32 %v2181_v41, %v3101_v62  ;;  %v885_v43 = vpop.f32.mrb[19].mxu1  ;;  %3704 = vst [vmem:[#allocation21_spill] sm:$0xff] %v3177_v46  ;;  %2255 = vmatpush3.bf16.msra.mxu1 %v2413_v30 }
 0x294   : > { %3702 = vst [vmem:[#allocation19_spill] sm:$0xff] %v3171_v44  ;;  %v3174_v45 = vadd.f32 %v3101_v62, %v885_v43  ;;  %2256 = vmatprep.subr.bf16.mxu1 %v2414_v31 }
 0x295   : > { %3701 = vst [vmem:[#allocation18_spill] sm:$0xff] %v3168_v42  ;;  %v954_v48 = vpack.c.bf16 %v3168_v42, %v3177_v46 }
 0x296   : > { %3703 = vst [vmem:[#allocation20_spill] sm:$0xff] %v3174_v45  ;;  %v953_v47 = vpack.c.bf16 %v3174_v45, %v3171_v44 }
 0x297   : > { %2257 = vmatpush3.bf16.msra.mxu1 %v2414_v31 }
 0x298   : > { %v2184_v49 = vpop.f32.mrb[20].mxu1  ;;  %2226 = vmatprep.mubr.bf16.mxu0 %v953_v47 }
 0x299   : > { %v898_v50 = vpop.f32.mrb[21].mxu1  ;;  %2227 = vmatmul.mubr.bf16.gmra.mrb[48].mxu0 %v954_v48  ;;  %v3193_v56 = vadd.f32 %v2184_v49, %v3101_v62 }
 0x29a   : > { %v2185_v51 = vpop.f32.mrb[22].mxu1  ;;  %v3187_v54 = vadd.f32 %v3101_v62, %v898_v50 }
 0x29b   : > { %v3184_v52 = vadd.f32 %v2185_v51, %v3101_v62  ;;  %v901_v53 = vpop.f32.mrb[23].mxu1  ;;  %3708 = vst [vmem:[#allocation25_spill] sm:$0xff] %v3193_v56 }
 0x29c   : > { %3706 = vst [vmem:[#allocation23_spill] sm:$0xff] %v3187_v54  ;;  %v3190_v55 = vadd.f32 %v3101_v62, %v901_v53 }
 0x29d   : > { %3705 = vst [vmem:[#allocation22_spill] sm:$0xff] %v3184_v52  ;;  %v956_v58 = vpack.c.bf16 %v3184_v52, %v3193_v56 }
 0x29e   : > { %3707 = vst [vmem:[#allocation24_spill] sm:$0xff] %v3190_v55  ;;  %v955_v57 = vpack.c.bf16 %v3190_v55, %v3187_v54 }
 0x2a0   : > { %v2188_v59 = vpop.f32.mrb[24].mxu1  ;;  %2230 = vmatprep.mubr.bf16.mxu0 %v955_v57 }
 0x2a1   : > { %v914_v60 = vpop.f32.mrb[25].mxu1  ;;  %2231 = vmatmul.mubr.bf16.gmra.mrb[52].mxu0 %v956_v58  ;;  %v3209_v6 = vadd.f32 %v2188_v59, %v3101_v62 }
 0x2a2   : > { %v2189_v7 = vpop.f32.mrb[26].mxu1  ;;  %v3203_v0 = vadd.f32 %v3101_v62, %v914_v60 }
 0x2a3   : > { %v3200_v61 = vadd.f32 %v2189_v7, %v3101_v62  ;;  %v917_v63 = vpop.f32.mrb[27].mxu1  ;;  %3712 = vst [vmem:[#allocation29_spill] sm:$0xff] %v3209_v6 }
 0x2a4   : > { %3710 = vst [vmem:[#allocation27_spill] sm:$0xff] %v3203_v0  ;;  %v3206_v2 = vadd.f32 %v3101_v62, %v917_v63 }
 0x2a5   : > { %3709 = vst [vmem:[#allocation26_spill] sm:$0xff] %v3200_v61  ;;  %v958_v9 = vpack.c.bf16 %v3200_v61, %v3209_v6 }
 0x2a6   : > { %3711 = vst [vmem:[#allocation28_spill] sm:$0xff] %v3206_v2  ;;  %v957_v8 = vpack.c.bf16 %v3206_v2, %v3203_v0 }
 0x2a8   : > { %v2192_v10 = vpop.f32.mrb[28].mxu1  ;;  %2234 = vmatprep.mubr.bf16.mxu0 %v957_v8 }
 0x2a9   : > { %v930_v11 = vpop.f32.mrb[29].mxu1  ;;  %2235 = vmatmul.mubr.bf16.gmra.mrb[56].mxu0 %v958_v9  ;;  %v3225_v21 = vadd.f32 %v2192_v10, %v3101_v62 }
 0x2aa   : > { %v2193_v13 = vpop.f32.mrb[30].mxu1  ;;  %v3219_v19 = vadd.f32 %v3101_v62, %v930_v11 }
 0x2ab   : > { %v3216_v17 = vadd.f32 %v2193_v13, %v3101_v62  ;;  %v933_v18 = vpop.f32.mrb[31].mxu1  ;;  %3716 = vst [vmem:[#allocation33_spill] sm:$0xff] %v3225_v21 }
 0x2ac   : > { %3714 = vst [vmem:[#allocation31_spill] sm:$0xff] %v3219_v19  ;;  %v3222_v20 = vadd.f32 %v3101_v62, %v933_v18  ;;  %v3234_v62 = vld [vmem:[%s3661_s6] ss:$0 sm:$0xff] }
 0x2ad   : > { %3713 = vst [vmem:[#allocation30_spill] sm:$0xff] %v3216_v17  ;;  %v960_v27 = vpack.c.bf16 %v3216_v17, %v3225_v21 }
 0x2ae   : > { %3715 = vst [vmem:[#allocation32_spill] sm:$0xff] %v3222_v20  ;;  %v959_v23 = vpack.c.bf16 %v3222_v20, %v3219_v19 }
 0x2b0   : > { %2238 = vmatprep.mubr.bf16.mxu0 %v959_v23 }
 0x2b1   : > { %2239 = vmatmul.mubr.bf16.gmra.mrb[60].mxu0 %v960_v27 }
 0x34c   : > { %v2212_v33 = vpop.f32.mrb[32].mxu0 }
 0x34d   : > { %v1075_v37 = vadd.f32 %v2212_v33, %v3234_v62  ;;  %v1066_v38 = vpop.f32.mrb[33].mxu0 }
 0x34e   : > { %v1067_v39 = vadd.f32 %v3234_v62, %v1066_v38  ;;  %v2213_v40 = vpop.f32.mrb[34].mxu0 }
 0x34f   : > { %v1227_v41 = vmul.f32 %v1075_v37, %v1075_v37  ;;  %v1078_v43 = vadd.f32 %v2213_v40, %v3234_v62  ;;  %v1069_v47 = vpop.f32.mrb[35].mxu0  ;;  %v3240_v60 = vmul.f32 0.5, %v1075_v37 }
 0x350   : > { %v1225_v48 = vmul.f32 %v1067_v39, %v1067_v39  ;;  %v1070_v49 = vadd.f32 %v3234_v62, %v1069_v47  ;;  %v3242_v9 = vmul.f32 0.5, %v1067_v39 }
 0x351   : > { %v1259_v50 = vmul.f32 %v1227_v41, %v1075_v37  ;;  %v1228_v51 = vmul.f32 %v1078_v43, %v1078_v43  ;;  %v3244_v11 = vmul.f32 0.5, %v1078_v43 }
 0x352   : > { %v1257_v53 = vmul.f32 %v1225_v48, %v1067_v39  ;;  %v1226_v57 = vmul.f32 %v1070_v49, %v1070_v49  ;;  %v3248_v31 = vmul.f32 0.5, %v1070_v49 }
 0x353   : > { %v1291_v58 = vmul.f32 0.044715, %v1259_v50  ;;  %v1260_v59 = vmul.f32 %v1228_v51, %v1078_v43 }
 0x354   : > { %v1289_v7 = vmul.f32 0.044715, %v1257_v53  ;;  %v1258_v63 = vmul.f32 %v1226_v57, %v1070_v49  ;;  %v2216_v8 = vpop.f32.mrb[36].mxu0 }
 0x355   : > { %v1323_v10 = vadd.f32 %v1291_v58, %v1075_v37  ;;  %v1292_v13 = vmul.f32 0.044715, %v1260_v59  ;;  %v1091_v18 = vadd.f32 %v2216_v8, %v3234_v62  ;;  %v1082_v23 = vpop.f32.mrb[37].mxu0 }
 0x356   : > { %v1321_v27 = vadd.f32 %v1289_v7, %v1067_v39  ;;  %v1290_v28 = vmul.f32 0.044715, %v1258_v63  ;;  %v1083_v29 = vadd.f32 %v3234_v62, %v1082_v23  ;;  %v2217_v30 = vpop.f32.mrb[38].mxu0 }
 0x357   : > { %v1355_v33 = vmul.f32 0.7978846, %v1323_v10  ;;  %v1324_v38 = vadd.f32 %v1292_v13, %v1078_v43  ;;  %v1231_v40 = vmul.f32 %v1091_v18, %v1091_v18  ;;  %v1094_v41 = vadd.f32 %v2217_v30, %v3234_v62  ;;  %v1085_v47 = vpop.f32.mrb[39].mxu0 }
 0x358   : > { %v1353_v37 = vmul.f32 0.7978846, %v1321_v27  ;;  %v1322_v48 = vadd.f32 %v1290_v28, %v1070_v49  ;;  %v1229_v50 = vmul.f32 %v1083_v29, %v1083_v29  ;;  %v1086_v51 = vadd.f32 %v3234_v62, %v1085_v47 }
 0x359   : > { %2415 = vtanh.f32 %v1355_v33  ;;  %v1356_v53 = vmul.f32 0.7978846, %v1324_v38  ;;  %v1263_v39 = vmul.f32 %v1231_v40, %v1091_v18  ;;  %v1232_v57 = vmul.f32 %v1094_v41, %v1094_v41 }
 0x35a   : > { %2417 = vtanh.f32 %v1353_v37  ;;  %v1354_v58 = vmul.f32 0.7978846, %v1322_v48  ;;  %v1261_v59 = vmul.f32 %v1229_v50, %v1083_v29  ;;  %v1230_v7 = vmul.f32 %v1086_v51, %v1086_v51 }
 0x35b   : > { %2419 = vtanh.f32 %v1356_v53  ;;  %v1295_v63 = vmul.f32 0.044715, %v1263_v39  ;;  %v1264_v43 = vmul.f32 %v1232_v57, %v1094_v41  ;;  %v3252_v8 = vmul.f32 0.5, %v1083_v29 }
 0x35c   : > { %2421 = vtanh.f32 %v1354_v58  ;;  %v1293_v10 = vmul.f32 0.044715, %v1261_v59  ;;  %v1262_v13 = vmul.f32 %v1230_v7, %v1086_v51  ;;  %v2220_v49 = vpop.f32.mrb[40].mxu0  ;;  %v3254_v23 = vmul.f32 0.5, %v1086_v51 }
 0x35d   : > { %v1327_v27 = vadd.f32 %v1295_v63, %v1091_v18  ;;  %v1296_v28 = vmul.f32 0.044715, %v1264_v43  ;;  %v3257_v30 = vadd.f32 %v2220_v49, %v3234_v62  ;;  %v1098_v33 = vpop.f32.mrb[41].mxu0  ;;  %v3259_v38 = vmul.f32 0.5, %v1091_v18 }
 0x35e   : > { %v1325_v40 = vadd.f32 %v1293_v10, %v1083_v29  ;;  %v1294_v47 = vmul.f32 0.044715, %v1262_v13  ;;  %v1099_v37 = vadd.f32 %v3234_v62, %v1098_v33  ;;  %v2221_v48 = vpop.f32.mrb[42].mxu0  ;;  %v3262_v50 = vmul.f32 0.5, %v1094_v41 }
 0x35f   : > { %v1359_v53 = vmul.f32 0.7978846, %v1327_v27  ;;  %v1328_v39 = vadd.f32 %v1296_v28, %v1094_v41  ;;  %v1235_v57 = vmul.f32 %v3257_v30, %v3257_v30  ;;  %v3267_v58 = vadd.f32 %v2221_v48, %v3234_v62  ;;  %v1101_v59 = vpop.f32.mrb[43].mxu0 }
 0x360   : > { %v1357_v7 = vmul.f32 0.7978846, %v1325_v40  ;;  %v1326_v63 = vadd.f32 %v1294_v47, %v1086_v51  ;;  %v1233_v18 = vmul.f32 %v1099_v37, %v1099_v37  ;;  %v3270_v29 = vadd.f32 %v3234_v62, %v1101_v59 }
 0x361   : > { %2423 = vtanh.f32 %v1359_v53  ;;  %v1360_v43 = vmul.f32 0.7978846, %v1328_v39  ;;  %v1267_v10 = vmul.f32 %v1235_v57, %v3257_v30  ;;  %v1236_v41 = vmul.f32 %v3267_v58, %v3267_v58 }
 0x362   : > { %2425 = vtanh.f32 %v1357_v7  ;;  %v1358_v13 = vmul.f32 0.7978846, %v1326_v63  ;;  %v1265_v49 = vmul.f32 %v1233_v18, %v1099_v37  ;;  %v1234_v27 = vmul.f32 %v3270_v29, %v3270_v29 }
 0x363   : > { %v2416_v28 = vpop.eup %2415  ;;  %2427 = vtanh.f32 %v1360_v43  ;;  %v1299_v51 = vmul.f32 0.044715, %v1267_v10  ;;  %v1268_v33 = vmul.f32 %v1236_v41, %v3267_v58  ;;  %v3278_v40 = vmul.f32 0.5, %v1099_v37 }
 0x364   : > { %v2418_v47 = vpop.eup %2417  ;;  %v1419_v48 = vadd.f32 1.0, %v2416_v28  ;;  %2429 = vtanh.f32 %v1358_v13  ;;  %v1297_v53 = vmul.f32 0.044715, %v1265_v49  ;;  %v1266_v39 = vmul.f32 %v1234_v27, %v3270_v29  ;;  %v2224_v57 = vpop.f32.mrb[44].mxu0 }
 0x365   : > { %v2420_v59 = vpop.eup %2419  ;;  %v1331_v7 = vadd.f32 %v1299_v51, %v3257_v30  ;;  %v1300_v63 = vmul.f32 0.044715, %v1268_v33  ;;  %v3283_v18 = vadd.f32 %v2224_v57, %v3234_v62  ;;  %v1114_v43 = vpop.f32.mrb[45].mxu0  ;;  %v1417_v10 = vadd.f32 1.0, %v2418_v47 }
 0x366   : > { %v2422_v20 = vpop.eup %2421  ;;  %v3286_v41 = vmul.f32 %v1419_v48, %v3240_v60  ;;  %v1420_v17 = vadd.f32 1.0, %v2420_v59  ;;  %v1329_v28 = vadd.f32 %v1297_v53, %v1099_v37  ;;  %v1298_v13 = vmul.f32 0.044715, %v1266_v39  ;;  %v2225_v49 = vpop.f32.mrb[46].mxu0 }
 0x367   : > { %v1363_v19 = vmul.f32 0.7978846, %v1331_v7  ;;  %v1332_v27 = vadd.f32 %v1300_v63, %v3267_v58  ;;  %v1239_v51 = vmul.f32 %v3283_v18, %v3283_v18  ;;  %v3292_v33 = vadd.f32 %v3234_v62, %v1114_v43  ;;  %v1117_v57 = vpop.f32.mrb[47].mxu0 }
 0x368   : > { %v1452_v47 = vmul.f32 %v1420_v17, %v3244_v11  ;;  %v1361_v21 = vmul.f32 0.7978846, %v1329_v28  ;;  %v1330_v60 = vadd.f32 %v1298_v13, %v3270_v29  ;;  %v3297_v48 = vadd.f32 %v2225_v49, %v3234_v62 }
 0x369   : > { %2431 = vtanh.f32 %v1363_v19  ;;  %v1364_v37 = vmul.f32 0.7978846, %v1332_v27  ;;  %v1271_v53 = vmul.f32 %v1239_v51, %v3283_v18  ;;  %v1237_v39 = vmul.f32 %v3292_v33, %v3292_v33 }
 0x36a   : > { %2433 = vtanh.f32 %v1361_v21  ;;  %v1362_v59 = vmul.f32 0.7978846, %v1330_v60  ;;  %v1240_v7 = vmul.f32 %v3297_v48, %v3297_v48  ;;  %v3305_v17 = vadd.f32 %v3234_v62, %v1117_v57 }
 0x36b   : > { %v3307_v11 = vpop.eup %2423  ;;  %2435 = vtanh.f32 %v1364_v37  ;;  %v1303_v63 = vmul.f32 0.044715, %v1271_v53  ;;  %v1269_v19 = vmul.f32 %v1237_v39, %v3292_v33  ;;  %v1418_v43 = vadd.f32 1.0, %v2422_v20 }
 0x36c   : > { %v2426_v28 = vpop.eup %2425  ;;  %2437 = vtanh.f32 %v1362_v59  ;;  %v1272_v13 = vmul.f32 %v1240_v7, %v3297_v48  ;;  %v1238_v21 = vmul.f32 %v3305_v17, %v3305_v17  ;;  %v2228_v49 = vpop.f32.mrb[48].mxu0  ;;  %v1449_v27 = vmul.f32 %v1417_v10, %v3242_v9 }
 0x36d   : > { %v3314_v51 = vpop.eup %2427  ;;  %v1335_v57 = vadd.f32 %v1303_v63, %v3283_v18  ;;  %v1301_v60 = vmul.f32 0.044715, %v1269_v19  ;;  %v3318_v37 = vadd.f32 %v2228_v49, %v3234_v62  ;;  %v1130_v53 = vpop.f32.mrb[49].mxu0  ;;  %v1450_v20 = vmul.f32 %v1418_v43, %v3248_v31 }
 0x36e   : > { %v2430_v39 = vpop.eup %2429  ;;  %v1304_v59 = vmul.f32 0.044715, %v1272_v13  ;;  %v1270_v7 = vmul.f32 %v1238_v21, %v3305_v17  ;;  %v3323_v2 = vadd.f32 %v3234_v62, %v1130_v53  ;;  %v2229_v61 = vpop.f32.mrb[50].mxu0  ;;  %v1482_v9 = vpack.c.bf16 %v1452_v47, %v3286_v41 }
 0x36f   : > { %v1367_v10 = vmul.f32 0.7978846, %v1335_v57  ;;  %v1333_v63 = vadd.f32 %v1301_v60, %v3292_v33  ;;  %v1243_v19 = vmul.f32 %v3318_v37, %v3318_v37  ;;  %v1481_v49 = vpack.c.bf16 %v1450_v20, %v1449_v27  ;;  %v1133_v0 = vpop.f32.mrb[51].mxu0 }
 0x370   : > { %v1336_v31 = vadd.f32 %v1304_v59, %v3297_v48  ;;  %v1302_v43 = vmul.f32 0.044715, %v1270_v7  ;;  %v1241_v13 = vmul.f32 %v3323_v2, %v3323_v2  ;;  %v3333_v21 = vadd.f32 %v2229_v61, %v3234_v62 }
 0x371   : > { %2439 = vtanh.f32 %v1367_v10  ;;  %v1365_v53 = vmul.f32 0.7978846, %v1333_v63  ;;  %v1275_v41 = vmul.f32 %v1243_v19, %v3318_v37  ;;  %2258 = vmatprep.mubr.bf16.mxu1 %v1481_v49  ;;  %v3337_v47 = vadd.f32 %v3234_v62, %v1133_v0 }
 0x372   : > { %v1368_v57 = vmul.f32 0.7978846, %v1336_v31  ;;  %v1334_v27 = vadd.f32 %v1302_v43, %v3305_v17  ;;  %v1273_v60 = vmul.f32 %v1241_v13, %v3323_v2  ;;  %v1244_v20 = vmul.f32 %v3333_v21, %v3333_v21  ;;  %2259 = vmatmul.mubr.bf16.vlgmr.msra.gmra.mrb[32].mxu1 %v1482_v9 }
 0x373   : > { %v3343_v59 = vpop.eup %2431  ;;  %2441 = vtanh.f32 %v1365_v53  ;;  %v1307_v61 = vmul.f32 0.044715, %v1275_v41  ;;  %v1242_v7 = vmul.f32 %v3337_v47, %v3337_v47  ;;  %v1421_v10 = vadd.f32 1.0, %v2426_v28 }
 0x374   : > { %v3347_v63 = vpop.eup %2433  ;;  %2443 = vtanh.f32 %v1368_v57  ;;  %v1366_v0 = vmul.f32 0.7978846, %v1334_v27  ;;  %v1305_v19 = vmul.f32 0.044715, %v1273_v60  ;;  %v1276_v49 = vmul.f32 %v1244_v20, %v3333_v21  ;;  %v2232_v31 = vpop.f32.mrb[52].mxu0 }
 0x375   : > { %v3350_v43 = vpop.eup %2435  ;;  %v1339_v9 = vadd.f32 %v1307_v61, %v3318_v37  ;;  %v1274_v13 = vmul.f32 %v1242_v7, %v3337_v47  ;;  %v3355_v53 = vadd.f32 %v2232_v31, %v3234_v62  ;;  %v1146_v41 = vpop.f32.mrb[53].mxu0  ;;  %v1422_v6 = vadd.f32 1.0, %v2430_v39 }
 0x376   : > { %v3357_v28 = vpop.eup %2437  ;;  %2445 = vtanh.f32 %v1366_v0  ;;  %v1337_v57 = vadd.f32 %v1305_v19, %v3323_v2  ;;  %v1308_v27 = vmul.f32 0.044715, %v1276_v49  ;;  %v3361_v60 = vadd.f32 %v3234_v62, %v1146_v41  ;;  %v2233_v20 = vpop.f32.mrb[54].mxu0 }
 0x377   : > { %v1371_v55 = vmul.f32 0.7978846, %v1339_v9  ;;  %v1306_v52 = vmul.f32 0.044715, %v1274_v13  ;;  %v1247_v61 = vmul.f32 %v3355_v53, %v3355_v53  ;;  %v1453_v7 = vmul.f32 %v1421_v10, %v3252_v8  ;;  %v1149_v31 = vpop.f32.mrb[55].mxu0 }
 0x378   : > { %v1369_v54 = vmul.f32 0.7978846, %v1337_v57  ;;  %v1340_v39 = vadd.f32 %v1308_v27, %v3333_v21  ;;  %v1245_v0 = vmul.f32 %v3361_v60, %v3361_v60  ;;  %v1454_v19 = vmul.f32 %v1422_v6, %v3254_v23 }
 0x379   : > { %2447 = vtanh.f32 %v1371_v55  ;;  %v1338_v49 = vadd.f32 %v1306_v52, %v3337_v47  ;;  %v1279_v9 = vmul.f32 %v1247_v61, %v3355_v53  ;;  %v3373_v13 = vadd.f32 %v2233_v20, %v3234_v62 }
 0x37a   : > { %2449 = vtanh.f32 %v1369_v54  ;;  %v1372_v41 = vmul.f32 0.7978846, %v1340_v39  ;;  %v1277_v8 = vmul.f32 %v1245_v0, %v3361_v60  ;;  %v1483_v10 = vpack.c.bf16 %v1454_v19, %v1453_v7 }
 0x37b   : > { %v3376_v57 = vpop.eup %2439  ;;  %v1370_v27 = vmul.f32 0.7978846, %v1338_v49  ;;  %v1311_v56 = vmul.f32 0.044715, %v1279_v9  ;;  %v1248_v6 = vmul.f32 %v3373_v13, %v3373_v13  ;;  %v1423_v55 = vadd.f32 1.0, %v3307_v11 }
 0x37c   : > { %2451 = vtanh.f32 %v1372_v41  ;;  %v1309_v52 = vmul.f32 0.044715, %v1277_v8  ;;  %2262 = vmatprep.mubr.bf16.mxu1 %v1483_v10  ;;  %v1424_v23 = vadd.f32 1.0, %v3314_v51  ;;  %v3383_v54 = vadd.f32 %v3234_v62, %v1149_v31  ;;  %v2236_v20 = vpop.f32.mrb[56].mxu0 }
 0x37d   : > { %v3385_v61 = vpop.eup %2441  ;;  %2453 = vtanh.f32 %v1370_v27  ;;  %v1343_v7 = vadd.f32 %v1311_v56, %v3355_v53  ;;  %v1280_v39 = vmul.f32 %v1248_v6, %v3373_v13  ;;  %v1455_v0 = vmul.f32 %v1423_v55, %v3259_v38  ;;  %v1162_v19 = vpop.f32.mrb[57].mxu0 }
 0x37e   : > { %v3390_v11 = vpop.eup %2443  ;;  %v1341_v49 = vadd.f32 %v1309_v52, %v3361_v60  ;;  %v1456_v51 = vmul.f32 %v1424_v23, %v3262_v50  ;;  %v1246_v31 = vmul.f32 %v3383_v54, %v3383_v54  ;;  %v3397_v9 = vadd.f32 %v2236_v20, %v3234_v62  ;;  %v2237_v41 = vpop.f32.mrb[58].mxu0 }
 0x37f   : > { %v1375_v8 = vmul.f32 0.7978846, %v1343_v7  ;;  %v1312_v56 = vmul.f32 0.044715, %v1280_v39  ;;  %v3400_v10 = vadd.f32 %v3234_v62, %v1162_v19  ;;  %v1202_v38 = vmul.f32 0.5, %v3270_v29  ;;  %v1165_v27 = vpop.f32.mrb[59].mxu0 }
 0x380   : > { %v3403_v6 = vpop.eup %2445  ;;  %v1373_v55 = vmul.f32 0.7978846, %v1341_v49  ;;  %v1484_v52 = vpack.c.bf16 %v1456_v51, %v1455_v0  ;;  %v1278_v50 = vmul.f32 %v1246_v31, %v3383_v54  ;;  %v1251_v23 = vmul.f32 %v3397_v9, %v3397_v9 }
 0x381   : > { %2455 = vtanh.f32 %v1375_v8  ;;  %v1344_v20 = vadd.f32 %v1312_v56, %v3373_v13  ;;  %v1249_v7 = vmul.f32 %v3400_v10, %v3400_v10  ;;  %v1425_v39 = vadd.f32 1.0, %v3347_v63 }
 0x382   : > { %2457 = vtanh.f32 %v1373_v55  ;;  %2263 = vmatmul.mubr.bf16.gmra.mrb[36].mxu1 %v1484_v52  ;;  %v1310_v29 = vmul.f32 0.044715, %v1278_v50  ;;  %v1283_v19 = vmul.f32 %v1251_v23, %v3397_v9  ;;  %v1426_v0 = vadd.f32 1.0, %v3357_v28 }
 0x383   : > { %v3414_v49 = vpop.eup %2447  ;;  %v1376_v51 = vmul.f32 0.7978846, %v1344_v20  ;;  %v1281_v31 = vmul.f32 %v1249_v7, %v3400_v10  ;;  %v1457_v8 = vmul.f32 %v1425_v39, %v3278_v40  ;;  %v3419_v56 = vadd.f32 %v2237_v41, %v3234_v62 }
 0x384   : > { %v3421_v45 = vpop.eup %2449  ;;  %v1342_v63 = vadd.f32 %v1310_v29, %v3383_v54  ;;  %v1315_v55 = vmul.f32 0.044715, %v1283_v19  ;;  %v1458_v52 = vmul.f32 %v1426_v0, %v1202_v38  ;;  %v1203_v50 = vmul.f32 0.5, %v3257_v30  ;;  %v2240_v23 = vpop.f32.mrb[60].mxu0 }
 0x385   : > { %2459 = vtanh.f32 %v1376_v51  ;;  %v1313_v28 = vmul.f32 0.044715, %v1281_v31  ;;  %v1252_v20 = vmul.f32 %v3419_v56, %v3419_v56  ;;  %v1204_v7 = vmul.f32 0.5, %v3267_v58  ;;  %v1178_v40 = vpop.f32.mrb[61].mxu0 }
 0x386   : > { %v3428_v39 = vpop.eup %2451  ;;  %v1374_v41 = vmul.f32 0.7978846, %v1342_v63  ;;  %v1347_v42 = vadd.f32 %v1315_v55, %v3397_v9  ;;  %v1485_v44 = vpack.c.bf16 %v1458_v52, %v1457_v8  ;;  %v1427_v29 = vadd.f32 1.0, %v3343_v59  ;;  %v2241_v38 = vpop.f32.mrb[62].mxu0 }
 0x387   : > { %v3432_v19 = vpop.eup %2453  ;;  %v1345_v30 = vadd.f32 %v1313_v28, %v3400_v10  ;;  %v1284_v0 = vmul.f32 %v1252_v20, %v3419_v56  ;;  %v1428_v51 = vadd.f32 1.0, %v3350_v43  ;;  %v3438_v58 = vadd.f32 %v3234_v62, %v1165_v27  ;;  %v1181_v31 = vpop.f32.mrb[63].mxu0 }
 0x388   : > { %2461 = vtanh.f32 %v1374_v41  ;;  %v1379_v63 = vmul.f32 0.7978846, %v1347_v42  ;;  %2266 = vmatprep.mubr.bf16.mxu1 %v1485_v44  ;;  %v1459_v55 = vmul.f32 %v1427_v29, %v1203_v50  ;;  %v3441_v8 = vadd.f32 %v2240_v23, %v3234_v62 }
 0x389   : > { %v1377_v59 = vmul.f32 0.7978846, %v1345_v30  ;;  %v1316_v52 = vmul.f32 0.044715, %v1284_v0  ;;  %v1460_v46 = vmul.f32 %v1428_v51, %v1204_v7  ;;  %v1250_v28 = vmul.f32 %v3438_v58, %v3438_v58 }
 0x38a   : > { %2463 = vtanh.f32 %v1379_v63  ;;  %v1255_v43 = vmul.f32 %v3441_v8, %v3441_v8  ;;  %v3448_v27 = vadd.f32 %v3234_v62, %v1178_v40  ;;  %v1205_v42 = vmul.f32 0.5, %v3292_v33 }
 0x38b   : > { %v3451_v44 = vpop.eup %2455  ;;  %2465 = vtanh.f32 %v1377_v59  ;;  %v1348_v50 = vadd.f32 %v1316_v52, %v3419_v56  ;;  %v1486_v23 = vpack.c.bf16 %v1460_v46, %v1459_v55  ;;  %v1282_v20 = vmul.f32 %v1250_v28, %v3438_v58 }
 0x38c   : > { %v2458_v7 = vpop.eup %2457  ;;  %v1287_v41 = vmul.f32 %v1255_v43, %v3441_v8  ;;  %v1253_v29 = vmul.f32 %v3448_v27, %v3448_v27  ;;  %v1206_v30 = vmul.f32 0.5, %v3305_v17  ;;  %v1429_v40 = vadd.f32 1.0, %v3385_v61 }
 0x38d   : > { %v1380_v0 = vmul.f32 0.7978846, %v1348_v50  ;;  %2267 = vmatmul.mubr.bf16.gmra.mrb[40].mxu1 %v1486_v23  ;;  %v1314_v33 = vmul.f32 0.044715, %v1282_v20  ;;  %v1430_v51 = vadd.f32 1.0, %v3403_v6  ;;  %v3462_v63 = vadd.f32 %v2241_v38, %v3234_v62 }
 0x38e   : > { %v1319_v46 = vmul.f32 0.044715, %v1287_v41  ;;  %v1285_v55 = vmul.f32 %v1253_v29, %v3448_v27  ;;  %v1461_v59 = vmul.f32 %v1429_v40, %v1205_v42  ;;  %v1207_v52 = vmul.f32 0.5, %v3283_v18 }
 0x38f   : > { %v2460_v28 = vpop.eup %2459  ;;  %2467 = vtanh.f32 %v1380_v0  ;;  %v1346_v17 = vadd.f32 %v1314_v33, %v3438_v58  ;;  %v1462_v43 = vmul.f32 %v1430_v51, %v1206_v30  ;;  %v1256_v61 = vmul.f32 %v3462_v63, %v3462_v63 }
 0x390   : > { %v1351_v50 = vadd.f32 %v1319_v46, %v3441_v8  ;;  %v1317_v6 = vmul.f32 0.044715, %v1285_v55  ;;  %v1208_v38 = vmul.f32 0.5, %v3297_v48  ;;  %v1431_v23 = vadd.f32 1.0, %v3376_v57 }
 0x391   : > { %v1378_v20 = vmul.f32 0.7978846, %v1346_v17  ;;  %v1487_v41 = vpack.c.bf16 %v1462_v43, %v1461_v59  ;;  %v1288_v42 = vmul.f32 %v1256_v61, %v3462_v63  ;;  %v1432_v18 = vadd.f32 1.0, %v3390_v11 }
 0x392   : > { %v2462_v29 = vpop.eup %2461  ;;  %v1383_v40 = vmul.f32 0.7978846, %v1351_v50  ;;  %v1349_v30 = vadd.f32 %v1317_v6, %v3448_v27  ;;  %v1463_v0 = vmul.f32 %v1431_v23, %v1207_v52  ;;  %v3476_v33 = vadd.f32 %v3234_v62, %v1181_v31 }
 0x393   : > { %2469 = vtanh.f32 %v1378_v20  ;;  %2270 = vmatprep.mubr.bf16.mxu1 %v1487_v41  ;;  %v1320_v51 = vmul.f32 0.044715, %v1288_v42  ;;  %v1464_v48 = vmul.f32 %v1432_v18, %v1208_v38  ;;  %v1209_v57 = vmul.f32 0.5, %v3323_v2 }
 0x394   : > { %v2464_v46 = vpop.eup %2463  ;;  %2471 = vtanh.f32 %v1383_v40  ;;  %v1381_v55 = vmul.f32 0.7978846, %v1349_v30  ;;  %v1254_v11 = vmul.f32 %v3476_v33, %v3476_v33  ;;  %v1210_v59 = vmul.f32 0.5, %v3337_v47 }
 0x395   : > { %v2466_v17 = vpop.eup %2465  ;;  %v1352_v52 = vadd.f32 %v1320_v51, %v3462_v63  ;;  %v1488_v43 = vpack.c.bf16 %v1464_v48, %v1463_v0  ;;  %v1433_v62 = vadd.f32 1.0, %v3421_v45  ;;  %v1434_v31 = vadd.f32 1.0, %v3432_v19 }
 0x396   : > { %2473 = vtanh.f32 %v1381_v55  ;;  %v1286_v61 = vmul.f32 %v1254_v11, %v3476_v33  ;;  %v1211_v2 = vmul.f32 0.5, %v3318_v37  ;;  %v1435_v23 = vadd.f32 1.0, %v3414_v49 }
 0x397   : > { %v1384_v50 = vmul.f32 0.7978846, %v1352_v52  ;;  %2271 = vmatmul.mubr.bf16.gmra.mrb[44].mxu1 %v1488_v43  ;;  %v1465_v6 = vmul.f32 %v1433_v62, %v1209_v57  ;;  %v1466_v38 = vmul.f32 %v1434_v31, %v1210_v59  ;;  %v1212_v20 = vmul.f32 0.5, %v3333_v21 }
 0x398   : > { %v1318_v47 = vmul.f32 0.044715, %v1286_v61  ;;  %v1436_v41 = vadd.f32 1.0, %v3428_v39  ;;  %v1213_v45 = vmul.f32 0.5, %v3361_v60  ;;  %v1214_v18 = vmul.f32 0.5, %v3383_v54 }
 0x399   : > { %v2468_v42 = vpop.eup %2467  ;;  %2475 = vtanh.f32 %v1384_v50  ;;  %v1489_v19 = vpack.c.bf16 %v1466_v38, %v1465_v6  ;;  %v1437_v40 = vadd.f32 1.0, %v2458_v7  ;;  %v1467_v30 = vmul.f32 %v1435_v23, %v1211_v2 }
 0x39a   : > { %v1350_v37 = vadd.f32 %v1318_v47, %v3476_v33  ;;  %v1468_v0 = vmul.f32 %v1436_v41, %v1212_v20  ;;  %v1438_v51 = vadd.f32 1.0, %v2462_v29  ;;  %v1215_v49 = vmul.f32 0.5, %v3355_v53 }
 0x39b   : > { %2274 = vmatprep.mubr.bf16.mxu1 %v1489_v19  ;;  %v1216_v21 = vmul.f32 0.5, %v3373_v13  ;;  %v1439_v39 = vadd.f32 1.0, %v3451_v44  ;;  %v1440_v48 = vadd.f32 1.0, %v2460_v28  ;;  %v1469_v55 = vmul.f32 %v1437_v40, %v1213_v45 }
 0x39c   : > { %v1382_v60 = vmul.f32 0.7978846, %v1350_v37  ;;  %v1490_v57 = vpack.c.bf16 %v1468_v0, %v1467_v30  ;;  %v1470_v11 = vmul.f32 %v1438_v51, %v1214_v18  ;;  %v1217_v52 = vmul.f32 0.5, %v3400_v10 }
 0x39d   : > { %v2470_v59 = vpop.eup %2469  ;;  %v1471_v54 = vmul.f32 %v1439_v39, %v1215_v49  ;;  %v1472_v7 = vmul.f32 %v1440_v48, %v1216_v21  ;;  %v1441_v43 = vadd.f32 1.0, %v2466_v17  ;;  %v1218_v53 = vmul.f32 0.5, %v3438_v58  ;;  %v2479_v48 = vld [vmem:[%s3015_s25 + $0x10] sm:$0xff] }
 0x39e   : > { %v2472_v62 = vpop.eup %2471  ;;  %2477 = vtanh.f32 %v1382_v60  ;;  %v1491_v29 = vpack.c.bf16 %v1470_v11, %v1469_v55  ;;  %v1442_v31 = vadd.f32 1.0, %v2470_v59  ;;  %v1219_v44 = vmul.f32 0.5, %v3397_v9  ;;  %v2480_v55 = vld [vmem:[%s3015_s25] sm:$0xff] }
 0x39f   : > { %2275 = vmatmul.mubr.bf16.gmra.mrb[48].mxu1 %v1490_v57  ;;  %v1492_v13 = vpack.c.bf16 %v1472_v7, %v1471_v54  ;;  %v1443_v28 = vadd.f32 1.0, %v2464_v46  ;;  %v1473_v2 = vmul.f32 %v1441_v43, %v1217_v52  ;;  %v1220_v6 = vmul.f32 0.5, %v3419_v56  ;;  %v2482_v54 = vld [vmem:[%s3015_s25 + $0x8] sm:$0xff] }
 0x3a0   : > { %v2474_v61 = vpop.eup %2473  ;;  %2278 = vmatprep.mubr.bf16.mxu1 %v1491_v29  ;;  %v1474_v50 = vmul.f32 %v1442_v31, %v1218_v53  ;;  %v1444_v38 = vadd.f32 1.0, %v2468_v42  ;;  %v1447_v47 = vadd.f32 1.0, %v2472_v62  ;;  %v1223_v58 = vmul.f32 0.5, %v3441_v8  ;;  %v2483_v29 = vld [vmem:[%s3015_s25 + $0x30] sm:$0xff] }
 0x3a1   : > { %v1475_v17 = vmul.f32 %v1443_v28, %v1219_v44  ;;  %v1224_v45 = vmul.f32 0.5, %v3462_v63  ;;  %v1445_v18 = vadd.f32 1.0, %v2474_v61  ;;  %v1221_v42 = vmul.f32 0.5, %v3448_v27  ;;  %v2484_v44 = vld [vmem:[%s3015_s25 + $0x20] sm:$0xff] }
 0x3a2   : > { %v1493_v10 = vpack.c.bf16 %v1474_v50, %v1473_v2  ;;  %v1476_v23 = vmul.f32 %v1444_v38, %v1220_v6  ;;  %v1479_v9 = vmul.f32 %v1447_v47, %v1223_v58  ;;  %v1222_v37 = vmul.f32 0.5, %v3476_v33  ;;  %v2485_v2 = vld [vmem:[%s3015_s25 + $0x38] sm:$0xff]  ;;  %v2486_v50 = vld [vmem:[%s3015_s25 + $0x28] sm:$0xff] }
 0x3a3   : > { %v2476_v20 = vpop.eup %2475  ;;  %v1477_v0 = vmul.f32 %v1445_v18, %v1221_v42 }
 0x3a4   : > { %v1494_v41 = vpack.c.bf16 %v1476_v23, %v1475_v17  ;;  %v1448_v19 = vadd.f32 1.0, %v2476_v20  ;;  %v2487_v17 = vld [vmem:[%s3015_s25 + $0x50] sm:$0xff] }
 0x3a6   : > { %v1480_v46 = vmul.f32 %v1448_v19, %v1224_v45  ;;  %v2489_v19 = vld [vmem:[%s3015_s25 + $0x58] sm:$0xff] }
 0x3a7   : > { %2279 = vmatmul.mubr.bf16.gmra.mrb[52].mxu1 %v1492_v13 }
 0x3a8   : > { %v2478_v40 = vpop.eup %2477  ;;  %2282 = vmatprep.mubr.bf16.mxu1 %v1493_v10  ;;  %v1496_v56 = vpack.c.bf16 %v1480_v46, %v1479_v9  ;;  %v2490_v9 = vld [vmem:[%s3015_s25 + $0x48] sm:$0xff] }
 0x3a9   : > { %v1446_v30 = vadd.f32 1.0, %v2478_v40 }
 0x3ab   : > { %v1478_v51 = vmul.f32 %v1446_v30, %v1222_v37 }
 0x3ad   : > { %v1495_v8 = vpack.c.bf16 %v1478_v51, %v1477_v0  ;;  %v2492_v0 = vld [vmem:[%s3015_s25 + $0x60] sm:$0xff] }
 0x3af   : > { %2283 = vmatmul.mubr.bf16.gmra.mrb[56].mxu1 %v1494_v41  ;;  %v2488_v41 = vld [vmem:[%s3015_s25 + $0x40] sm:$0xff] }
 0x3b0   : > { %2286 = vmatprep.mubr.bf16.mxu1 %v1495_v8 }
 0x3b7   : > { %2287 = vmatmul.mubr.bf16.gmra.mrb[60].mxu1 %v1496_v56  ;;  %v2491_v56 = vld [vmem:[%s3015_s25 + $0x70] sm:$0xff] }
 0x445   : > { %v2260_v63 = vpop.f32.mrb[32].mxu1 }
 0x446   : > { %v1724_v49 = vadd.f32 %v2260_v63, %v3113_v5  ;;  %v1595_v21 = vpop.f32.mrb[33].mxu1  ;;  %v2493_v63 = vld [vmem:[%s3015_s25 + $0x78] sm:$0xff] }
 0x447   : > { %v1722_v39 = vadd.f32 %v1595_v21, %v3107_v3  ;;  %v2261_v27 = vpop.f32.mrb[34].mxu1  ;;  %v2481_v3 = vld [vmem:[%s3015_s25 + $0x18] sm:$0xff] }
 0x448   : > { %v1756_v33 = vadd.f32 %v2479_v48, %v1724_v49  ;;  %v1725_v60 = vadd.f32 %v2261_v27, %v3104_v1  ;;  %v1598_v57 = vpop.f32.mrb[35].mxu1  ;;  %v2494_v49 = vld [vmem:[%s3015_s25 + $0x68] sm:$0xff] }
 0x449   : > { %v1754_v11 = vadd.f32 %v2480_v55, %v1722_v39  ;;  %v1723_v59 = vadd.f32 %v1598_v57, %v3110_v4  ;;  %v3718_v48 = vld [vmem:[#allocation19_spill] sm:$0xff]  ;;  %v3719_v55 = vld [vmem:[#allocation18_spill] sm:$0xff] }
 0x44a   : > { %1788 = vst [vmem:[%s3512_s22 + $0x10] sm:$0xff] %v1756_v33  ;;  %v1757_v5 = vadd.f32 %v2481_v3, %v1725_v60  ;;  %v2495_v60 = vld [vmem:[%s3015_s25 + $0x90] sm:$0xff]  ;;  %v2496_v3 = vld [vmem:[%s3015_s25 + $0x80] sm:$0xff] }
 0x44b   : > { %1786 = vst [vmem:[%s3512_s22] sm:$0xff] %v1754_v11  ;;  %v1755_v1 = vadd.f32 %v2482_v54, %v1723_v59  ;;  %v3720_v54 = vld [vmem:[#allocation20_spill] sm:$0xff] }
 0x44c   : > { %1789 = vst [vmem:[%s3512_s22 + $0x18] sm:$0xff] %v1757_v5 }
 0x44d   : > { %1787 = vst [vmem:[%s3512_s22 + $0x8] sm:$0xff] %v1755_v1 }
 0x455   : > { %v2264_v4 = vpop.f32.mrb[36].mxu1 }
 0x456   : > { %v1728_v7 = vadd.f32 %v2264_v4, %v3129_v16  ;;  %v1611_v52 = vpop.f32.mrb[37].mxu1  ;;  %v2497_v4 = vld [vmem:[%s3015_s25 + $0x98] sm:$0xff] }
 0x457   : > { %v1726_v43 = vadd.f32 %v1611_v52, %v3123_v14  ;;  %v2265_v62 = vpop.f32.mrb[38].mxu1  ;;  %v2498_v52 = vld [vmem:[%s3015_s25 + $0x88] sm:$0xff] }
 0x458   : > { %v1760_v53 = vadd.f32 %v2483_v29, %v1728_v7  ;;  %v1729_v31 = vadd.f32 %v2265_v62, %v3120_v12  ;;  %v1614_v13 = vpop.f32.mrb[39].mxu1  ;;  %v3721_v29 = vld [vmem:[#allocation25_spill] sm:$0xff] }
 0x459   : > { %v1758_v28 = vadd.f32 %v2484_v44, %v1726_v43  ;;  %v1727_v61 = vadd.f32 %v1614_v13, %v3126_v15  ;;  %v3722_v13 = vld [vmem:[#allocation23_spill] sm:$0xff] }
 0x45a   : > { %1792 = vst [vmem:[%s3512_s22 + $0x30] sm:$0xff] %v1760_v53  ;;  %v1761_v16 = vadd.f32 %v2485_v2, %v1729_v31 }
 0x45b   : > { %1790 = vst [vmem:[%s3512_s22 + $0x20] sm:$0xff] %v1758_v28  ;;  %v1759_v14 = vadd.f32 %v2486_v50, %v1727_v61  ;;  %v2499_v61 = vld [vmem:[%s3015_s25 + $0xb0] sm:$0xff] }
 0x45c   : > { %1793 = vst [vmem:[%s3512_s22 + $0x38] sm:$0xff] %v1761_v16  ;;  %v3723_v16 = vld [vmem:[#allocation22_spill] sm:$0xff] }
 0x45d   : > { %1791 = vst [vmem:[%s3512_s22 + $0x28] sm:$0xff] %v1759_v14 }
 0x460   : > { %v2268_v6 = vpop.f32.mrb[40].mxu1 }
 0x461   : > { %v1732_v12 = vadd.f32 %v2268_v6, %v3145_v26  ;;  %v1627_v38 = vpop.f32.mrb[41].mxu1  ;;  %v2500_v6 = vld [vmem:[%s3015_s25 + $0xa0] sm:$0xff] }
 0x462   : > { %v1730_v15 = vadd.f32 %v1627_v38, %v3139_v24  ;;  %v2269_v10 = vpop.f32.mrb[42].mxu1  ;;  %v3724_v38 = vld [vmem:[#allocation24_spill] sm:$0xff] }
 0x463   : > { %v1764_v23 = vadd.f32 %v2487_v17, %v1732_v12  ;;  %v1733_v47 = vadd.f32 %v2269_v10, %v3136_v22  ;;  %v1630_v20 = vpop.f32.mrb[43].mxu1  ;;  %v2501_v10 = vld [vmem:[%s3015_s25 + $0xb8] sm:$0xff] }
 0x464   : > { %v1762_v58 = vadd.f32 %v2488_v41, %v1730_v15  ;;  %v1731_v45 = vadd.f32 %v1630_v20, %v3142_v25  ;;  %v3725_v41 = vld [vmem:[#allocation29_spill] sm:$0xff] }
 0x465   : > { %1796 = vst [vmem:[%s3512_s22 + $0x50] sm:$0xff] %v1764_v23  ;;  %v1765_v26 = vadd.f32 %v2489_v19, %v1733_v47  ;;  %v2502_v23 = vld [vmem:[%s3015_s25 + $0xa8] sm:$0xff] }
 0x466   : > { %1794 = vst [vmem:[%s3512_s22 + $0x40] sm:$0xff] %v1762_v58  ;;  %v1763_v24 = vadd.f32 %v2490_v9, %v1731_v45  ;;  %v3726_v19 = vld [vmem:[#allocation27_spill] sm:$0xff] }
 0x467   : > { %1797 = vst [vmem:[%s3512_s22 + $0x58] sm:$0xff] %v1765_v26 }
 0x468   : > { %1795 = vst [vmem:[%s3512_s22 + $0x48] sm:$0xff] %v1763_v24  ;;  %v2503_v24 = vld [vmem:[%s3015_s25 + $0xd0] sm:$0xff] }
 0x46a   : > { %v2272_v46 = vpop.f32.mrb[44].mxu1 }
 0x46b   : > { %v1736_v22 = vadd.f32 %v2272_v46, %v3161_v36  ;;  %v1643_v18 = vpop.f32.mrb[45].mxu1 }
 0x46c   : > { %v1734_v25 = vadd.f32 %v1643_v18, %v3155_v34  ;;  %v2273_v40 = vpop.f32.mrb[46].mxu1 }
 0x46d   : > { %v1768_v42 = vadd.f32 %v2491_v56, %v1736_v22  ;;  %v1737_v37 = vadd.f32 %v2273_v40, %v3152_v32  ;;  %v1646_v30 = vpop.f32.mrb[47].mxu1  ;;  %v3717_v32 = vld [vmem:[#allocation21_spill] sm:$0xff]  ;;  %v3727_v22 = vld [vmem:[#allocation26_spill] sm:$0xff] }
 0x46e   : > { %v1766_v51 = vadd.f32 %v2492_v0, %v1734_v25  ;;  %v1735_v8 = vadd.f32 %v1646_v30, %v3158_v35  ;;  %v2504_v40 = vld [vmem:[%s3015_s25 + $0xc0] sm:$0xff]  ;;  %v2505_v30 = vld [vmem:[%s3015_s25 + $0xd8] sm:$0xff] }
 0x46f   : > { %1800 = vst [vmem:[%s3512_s22 + $0x70] sm:$0xff] %v1768_v42  ;;  %v1769_v36 = vadd.f32 %v2493_v63, %v1737_v37  ;;  %v3728_v42 = vld [vmem:[#allocation28_spill] sm:$0xff] }
 0x470   : > { %1798 = vst [vmem:[%s3512_s22 + $0x60] sm:$0xff] %v1766_v51  ;;  %v1767_v34 = vadd.f32 %v2494_v49, %v1735_v8  ;;  %v2506_v51 = vld [vmem:[%s3015_s25 + $0xc8] sm:$0xff] }
 0x471   : > { %1801 = vst [vmem:[%s3512_s22 + $0x78] sm:$0xff] %v1769_v36  ;;  %v3729_v36 = vld [vmem:[#allocation33_spill] sm:$0xff] }
 0x472   : > { %1799 = vst [vmem:[%s3512_s22 + $0x68] sm:$0xff] %v1767_v34  ;;  %v2276_v21 = vpop.f32.mrb[48].mxu1 }
 0x473   : > { %v1740_v39 = vadd.f32 %v2276_v21, %v3717_v32  ;;  %v1659_v27 = vpop.f32.mrb[49].mxu1  ;;  %v3730_v21 = vld [vmem:[#allocation31_spill] sm:$0xff] }
 0x474   : > { %v1738_v35 = vadd.f32 %v1659_v27, %v3718_v48  ;;  %v2277_v33 = vpop.f32.mrb[50].mxu1  ;;  %v2507_v27 = vld [vmem:[%s3015_s25 + $0xf0] sm:$0xff] }
 0x475   : > { %v1772_v57 = vadd.f32 %v2495_v60, %v1740_v39  ;;  %v1741_v11 = vadd.f32 %v2277_v33, %v3719_v55  ;;  %v1662_v59 = vpop.f32.mrb[51].mxu1 }
 0x476   : > { %v1770_v5 = vadd.f32 %v2496_v3, %v1738_v35  ;;  %v1739_v1 = vadd.f32 %v1662_v59, %v3720_v54  ;;  %v3731_v35 = vld [vmem:[#allocation30_spill] sm:$0xff]  ;;  %v2509_v3 = vld [vmem:[%s3015_s25 + $0xf8] sm:$0xff]  ;;  %v2510_v54 = vld [vmem:[%s3015_s25 + $0xe8] sm:$0xff] }
 0x477   : > { %1804 = vst [vmem:[%s3512_s22 + $0x90] sm:$0xff] %v1772_v57  ;;  %v1773_v7 = vadd.f32 %v2497_v4, %v1741_v11  ;;  %v2508_v57 = vld [vmem:[%s3015_s25 + $0xe0] sm:$0xff]  ;;  %v3732_v11 = vld [vmem:[#allocation32_spill] sm:$0xff] }
 0x478   : > { %1802 = vst [vmem:[%s3512_s22 + $0x80] sm:$0xff] %v1770_v5  ;;  %v1771_v43 = vadd.f32 %v2498_v52, %v1739_v1 }
 0x479   : > { %1805 = vst [vmem:[%s3512_s22 + $0x98] sm:$0xff] %v1773_v7 }
 0x47a   : > { %1803 = vst [vmem:[%s3512_s22 + $0x88] sm:$0xff] %v1771_v43  ;;  %v2280_v62 = vpop.f32.mrb[52].mxu1 }
 0x47b   : > { %v1744_v53 = vadd.f32 %v2280_v62, %v3721_v29  ;;  %v1675_v31 = vpop.f32.mrb[53].mxu1 }
 0x47c   : > { %v1742_v44 = vadd.f32 %v1675_v31, %v3722_v13  ;;  %v2281_v28 = vpop.f32.mrb[54].mxu1 }
 0x47d   : > { %v1776_v2 = vadd.f32 %v2499_v61, %v1744_v53  ;;  %v1745_v50 = vadd.f32 %v2281_v28, %v3723_v16  ;;  %v1678_v14 = vpop.f32.mrb[55].mxu1 }
 0x47e   : > { %v1774_v12 = vadd.f32 %v2500_v6, %v1742_v44  ;;  %v1743_v15 = vadd.f32 %v1678_v14, %v3724_v38 }
 0x47f   : > { %1808 = vst [vmem:[%s3512_s22 + $0xb0] sm:$0xff] %v1776_v2  ;;  %v1777_v17 = vadd.f32 %v2501_v10, %v1745_v50 }
 0x480   : > { %1806 = vst [vmem:[%s3512_s22 + $0xa0] sm:$0xff] %v1774_v12  ;;  %v1775_v47 = vadd.f32 %v2502_v23, %v1743_v15 }
 0x481   : > { %1809 = vst [vmem:[%s3512_s22 + $0xb8] sm:$0xff] %v1777_v17 }
 0x482   : > { %1807 = vst [vmem:[%s3512_s22 + $0xa8] sm:$0xff] %v1775_v47  ;;  %v2284_v20 = vpop.f32.mrb[56].mxu1 }
 0x483   : > { %v1748_v58 = vadd.f32 %v2284_v20, %v3725_v41  ;;  %v1691_v45 = vpop.f32.mrb[57].mxu1 }
 0x484   : > { %v1746_v26 = vadd.f32 %v1691_v45, %v3726_v19  ;;  %v2285_v9 = vpop.f32.mrb[58].mxu1 }
 0x485   : > { %v1780_v46 = vadd.f32 %v2503_v24, %v1748_v58  ;;  %v1749_v18 = vadd.f32 %v2285_v9, %v3727_v22  ;;  %v1694_v25 = vpop.f32.mrb[59].mxu1 }
 0x486   : > { %v1778_v56 = vadd.f32 %v2504_v40, %v1746_v26  ;;  %v1747_v37 = vadd.f32 %v1694_v25, %v3728_v42 }
 0x487   : > { %1812 = vst [vmem:[%s3512_s22 + $0xd0] sm:$0xff] %v1780_v46  ;;  %v1781_v0 = vadd.f32 %v2505_v30, %v1749_v18 }
 0x488   : > { %1810 = vst [vmem:[%s3512_s22 + $0xc0] sm:$0xff] %v1778_v56  ;;  %v1779_v8 = vadd.f32 %v2506_v51, %v1747_v37 }
 0x489   : > { %1813 = vst [vmem:[%s3512_s22 + $0xd8] sm:$0xff] %v1781_v0 }
 0x48a   : > { %1811 = vst [vmem:[%s3512_s22 + $0xc8] sm:$0xff] %v1779_v8  ;;  %v2288_v63 = vpop.f32.mrb[60].mxu1 }
 0x48b   : > { %v1752_v49 = vadd.f32 %v2288_v63, %v3729_v36  ;;  %v1707_v34 = vpop.f32.mrb[61].mxu1 }
 0x48c   : > { %v1750_v32 = vadd.f32 %v1707_v34, %v3730_v21  ;;  %v2289_v39 = vpop.f32.mrb[62].mxu1 }
 0x48d   : > { %v1784_v48 = vadd.f32 %v2507_v27, %v1752_v49  ;;  %v1753_v33 = vadd.f32 %v2289_v39, %v3731_v35  ;;  %v1710_v60 = vpop.f32.mrb[63].mxu1 }
 0x48e   : > { %v1782_v55 = vadd.f32 %v2508_v57, %v1750_v32  ;;  %v1751_v59 = vadd.f32 %v1710_v60, %v3732_v11 }
 0x48f   : > { %1816 = vst [vmem:[%s3512_s22 + $0xf0] sm:$0xff] %v1784_v48  ;;  %v1785_v5 = vadd.f32 %v2509_v3, %v1753_v33 }
 0x490   : > { %1814 = vst [vmem:[%s3512_s22 + $0xe0] sm:$0xff] %v1782_v55  ;;  %v1783_v1 = vadd.f32 %v2510_v54, %v1751_v59 }
 0x491   : > { %1817 = vst [vmem:[%s3512_s22 + $0xf8] sm:$0xff] %v1785_v5 }
 0x492   : > { %1815 = vst [vmem:[%s3512_s22 + $0xe8] sm:$0xff] %v1783_v1 }
 0x493   : > { %2666 = shalt.err (!%p2663_p13)
}
 0x494   : > { %s2667_s25 = scalar_lea.hbm %s3605_s9, 4096  ;;  %s2671_s18 = scalar_lea.hbm %s3663_s8, 8192 }
 0x495   : > { %p2668_p9 = scmp.ne.s32.totalorder %s3605_s9, %s2667_s25  ;;  %p2672_p4 = scmp.lt.u32.totalorder %s3605_s9, %s3663_s8 }
 0x496   : > { %p2673_p8 = scmp.lt.u32.totalorder %s2671_s18, %s2667_s25  ;;  %p2675_p3 = scmp.lt.u32.totalorder %s2667_s25, %s3605_s9 }
 0x497   : > { %p2669_p0 = pnand %p2668_p9, %p2957_p10 }
 0x498   : > { %p2674_p6 = por %p2673_p8, %p2672_p4 }
 0x499   : > { %p2670_p11 = pneg %p2669_p0 }
 0x49a   : > { %p2676_p5 = por %p2675_p3, %p2674_p6 }
 0x49c   : > { %p2677_p7 = pnand %p2676_p5, %p2670_p11 }
 0x49e   : > { %2680 = shalt.err (!%p2677_p7)
}
 0x49f   : > { %s2739_s27 = smov 128   ;;  %s2740_s12 = smov 8  }
 0x4a0   : > { %2308 = dma.vmem_to_hbm [thread:$0]  (%p2957_p10), %s3607_s16, 4096, %s3605_s9, %s1819_s19, %s2739_s27, %s2739_s27, %s2740_s12  }
 0x4a1 PF: > { %s3733_s21 = sld [smem:[#allocation16_spill]]  ;;  %s3734_s11 = sld [smem:[#allocation17_spill]] }
 0x4a2   : > { %p3736_p1 = scmp.ge.s32.totalorder %s2727_s30, 2 }
 0x4a7   : > { %s1847_s13 = sand.u32 1, %s3733_s21   ;;  %p3735_p12 = scmp.ne.s32.totalorder %s3734_s11, 0 }
 0x4a8   : > { %s1848_s14 = scalar_lea.sflag [#allocation4], %s1847_s13 }
 0x4a9   : > { %p2328_p2 = pnand %p3736_p1, %p3735_p12 }
 0x4ab   : > { %2710 = dma.done.wait (!%p2328_p2), %s1848_s14, 4096  }
 0x4ac   : > { %2712 = vsyncadd (!%p2328_p2), %s1848_s14, 4294963200  ;;  %p23_p13 = scmp.ge.s32.totalorder %s2947_s26, 4   ;;  %s3737_s27 = smov %s2719_s28 }
 0x4ad   : > { %s3738_s28 = smov %s2723_s29  ;;  %s3739_s29 = smov %s2963_s24 }
 0x4ae   : > { %s3740_s30 = smov %s2947_s26  ;;  %25 = sbr.rel (!%p23_p13) target bundleno = 7 (0x7), region = 113 }
 0x4b5   :  { %1853 = vsyncpa [#allocation3], 1 }
 0x4b6   :  { %1855 = vsyncpa [#allocation3 + $0x1], 1 }
 0x4b7   :  { %1856 = vsyncpa [#allocation6], 1 }
 0x4b8   :  { %1857 = vsyncpa [#allocation9], 1 }
 0x4b9   :  { %1858 = vsyncpa [#allocation4], 1 }
 0x4ba   :  { %1860 = vsyncpa [#allocation4 + $0x1], 1 }

</bundles_post_ra>
